<compile_context>
chip_gen: v7x
topology: tpu7x:2x2x1
jax: 0.10.0
libtpu: 0.0.40
codegen_flags: <defaults>
</compile_context>

<pallas_src>
import functools

import jax
import jax.numpy as jnp
import numpy as np
from jax.experimental import pallas as pl
from jax.experimental.pallas import tpu as pltpu


# ----------------------------- kernel ---------------------------------------

def vertical_embedding_kernel(x_ref,
                              w1, b1, w2, b2, w3, b3, w4, b4, w5, b5,
                              o_ref, *, seq_len):
    """x_ref: (TB*L, 8) f32.  wN: (3*Cin, Cout) bf16.  bN: (1, Cout) f32.
    o_ref: (TB*L, 32) f32.

    PyTorch Conv1d (cross-correlation, padding=1):
      y[l, co] = b[co] + sum_k sum_ci W[co, ci, k] * x[l + k - 1, ci]
    so the fused weight rows are ordered [k=0 (x[l-1]) | k=1 (x[l]) | k=2 (x[l+1])].
    """
    m = x_ref.shape[0]                              # TB * L rows

    # Boundary masks (hoisted; reused by every layer).  Row i belongs to sequence
    # position i % L of its batch element.
    l_idx = jax.lax.broadcasted_iota(jnp.int32, (m, 1), 0) % seq_len
    not_first = l_idx != 0                          # l > 0   -> x[l-1] valid
    not_last = l_idx != (seq_len - 1)               # l < L-1 -> x[l+1] valid

    def conv_layer(h, w_ref, b_ref, relu):
        # Shifted copies via XLU roll; zero the rows that cross a sequence (or batch)
        # boundary.  roll(h, s)[i] = h[(i - s) mod m], so s=1 -> x[l-1], s=m-1 -> x[l+1].
        prev = jnp.where(not_first, pltpu.roll(h, 1, axis=0), 0.0)
        nxt = jnp.where(not_last, pltpu.roll(h, m - 1, axis=0), 0.0)
        x_cat = jnp.concatenate([prev, h, nxt], axis=-1).astype(jnp.bfloat16)
        y = jnp.dot(x_cat, w_ref[...], preferred_element_type=jnp.float32)
        y = y + b_ref[...]                          # bias in f32
        return jnp.maximum(y, 0.0) if relu else y

    h = x_ref[...]                                  # (M, 8) f32
    for w_ref, b_ref, relu in ((w1, b1, True), (w2, b2, True), (w3, b3, True),
                               (w4, b4, True), (w5, b5, False)):
        h = conv_layer(h, w_ref, b_ref, relu)       # -> (M, 64) ... (M, 32)

    o_ref[...] = h.astype(o_ref.dtype)


# ----------------------------- wrapper ---------------------------------------

def _choose_block_batch(n, seq_len, target):
    """Largest tb <= target dividing n with (tb*seq_len) % 8 == 0; else whole array."""
    for tb in range(max(1, min(target, n)), 0, -1):
        if n % tb == 0 and (tb * seq_len) % 8 == 0:
            return tb
    return n                                        # single full block (no tiling rule)


def vertical_embedding_forward(x_ncl, params, *, block_batch=128):
    """x_ncl: (N, 8, L) float32, params: list of 5 (w(3,Cin,Cout), b(1,Cout)).

    Returns (N*L, 32), matching net(x).permute(0,2,1).reshape(-1,32).
    """
    N, Cin, L = x_ncl.shape
    assert Cin == 8

    tb = _choose_block_batch(N, L, block_batch)     # batch elements per grid step
    m_blk = tb * L                                  # rows per grid step

    # Layout plumbing done in XLA (free / cheap): NCL -> NLC -> (N*L, 8).
    x_flat = jnp.transpose(x_ncl, (0, 2, 1)).reshape(N * L, Cin).astype(jnp.float32)

    # Fuse the 3 conv taps into a single K = 3*Cin weight; bf16 MXU operands.
    w_cats, biases = [], []
    for (w, b) in params:
        w_cats.append(jnp.concatenate([w[0], w[1], w[2]], axis=0).astype(jnp.bfloat16))
        biases.append(b.astype(jnp.float32))

    in_specs = [pl.BlockSpec((m_blk, Cin), lambda n: (n, 0))]
    flat_params = []
    for w, b in zip(w_cats, biases):
        in_specs.append(pl.BlockSpec(tuple(w.shape), lambda n: (0, 0)))
        in_specs.append(pl.BlockSpec(tuple(b.shape), lambda n: (0, 0)))
        flat_params += [w, b]

    flops = 2 * N * L * sum(int(w.shape[0]) * int(w.shape[1]) for w in w_cats)
    bytes_accessed = (x_flat.size * 4 + N * L * 32 * 4
                      + sum(int(w.size) * 2 + int(b.size) * 4
                            for w, b in zip(w_cats, biases)))

    kernel = functools.partial(vertical_embedding_kernel, seq_len=L)

    out = pl.pallas_call(
        kernel,
        out_shape=jax.ShapeDtypeStruct((N * L, 32), jnp.float32),
        grid=(N * L // m_blk,),
        in_specs=in_specs,
        out_specs=pl.BlockSpec((m_blk, 32), lambda n: (n, 0)),
        compiler_params=pltpu.CompilerParams(
            dimension_semantics=("parallel",)),
        cost_estimate=pl.CostEstimate(flops=flops, transcendentals=0,
                                      bytes_accessed=bytes_accessed),
    )(x_flat, *flat_params)

    return out                                      # already (N*L, 32), row-major


# ----------------------------- reference (plain JAX, f32) --------------------

def reference_forward(x_ncl, params):
    h = x_ncl.astype(jnp.float32)
    for i, (w, b) in enumerate(params):
        w_oiw = jnp.transpose(w, (2, 1, 0))         # (Cout, Cin, 3)
        h = jax.lax.conv_general_dilated(
            h, w_oiw, window_strides=(1,), padding=((1, 1),),
            dimension_numbers=("NCW", "OIW", "NCW"))
        h = h + b.reshape(1, -1, 1)
        if i < 4:
            h = jnp.maximum(h, 0.0)
    return jnp.transpose(h, (0, 2, 1)).reshape(-1, 32)


# ----------------------------- params ----------------------------------------

def init_params(key):
    """Deterministic synthetic weights with the module's shapes.

    Layer i weight stored as (3, Cin, Cout) (== torch (Cout, Cin, 3) transposed),
    bias as (1, Cout).
    """
    shapes = [(8, 64), (64, 64), (64, 64), (64, 64), (64, 32)]
    params = []
    for (cin, cout) in shapes:
        key, kw, kb = jax.random.split(key, 3)
        scale = 1.0 / np.sqrt(cin * 3)
        w = jax.random.uniform(kw, (3, cin, cout), jnp.float32, -scale, scale)
        b = jax.random.uniform(kb, (1, cout), jnp.float32, -scale, scale)
        params.append((w, b))
    return params


# ----------------------------- main -------------------------------------------

if __name__ == "__main__":
    key = jax.random.PRNGKey(0)
    key, kx = jax.random.split(key)

    N, C, L = 8, 8, 16                              # (batch, in_channels, length)
    x = jax.random.normal(kx, (N, C, L), jnp.float32)

    params = init_params(key)

    # block_batch=4 -> TB=4, grid=(2,): multiple batch elements per step and >=2 steps
    # so both v7x TensorCores get work.
    out = vertical_embedding_forward(x, params, block_batch=4)
    out = jax.block_until_ready(out)
    assert out.shape == (N * L, 32), out.shape

    ref = jax.block_until_ready(reference_forward(x, params))
    # bf16 MXU operands (per perf review) vs f32 reference -> looser tolerance.
    np.testing.assert_allclose(np.asarray(out), np.asarray(ref),
                               rtol=2e-2, atol=2e-2)

    print("KERNEL_OK")
</pallas_src>

<mosaic_0001>
module attributes {stable_mosaic.version = 11 : i64} {
  func.func @vertical_embedding_kernel(%arg0: i32, %arg1: memref<64x8xf32, #tpu.memory_space<vmem>>, %arg2: memref<24x64xbf16, #tpu.memory_space<vmem>>, %arg3: memref<1x64xf32, #tpu.memory_space<vmem>>, %arg4: memref<192x64xbf16, #tpu.memory_space<vmem>>, %arg5: memref<1x64xf32, #tpu.memory_space<vmem>>, %arg6: memref<192x64xbf16, #tpu.memory_space<vmem>>, %arg7: memref<1x64xf32, #tpu.memory_space<vmem>>, %arg8: memref<192x64xbf16, #tpu.memory_space<vmem>>, %arg9: memref<1x64xf32, #tpu.memory_space<vmem>>, %arg10: memref<192x32xbf16, #tpu.memory_space<vmem>>, %arg11: memref<1x32xf32, #tpu.memory_space<vmem>>, %arg12: memref<64x32xf32, #tpu.memory_space<vmem>>) attributes {dimension_semantics = [#tpu.dimension_semantics<parallel>], iteration_bounds = array<i64: 2>, scalar_prefetch = 0 : i64, scratch_operands = 0 : i64, tpu.core_type = #tpu.core_type<tc>, window_params = [{transform_indices = @transform_0, window_bounds = array<i64: 64, 8>}, {pipeline_mode = #tpu.pipeline_mode<synchronous>, transform_indices = @transform_1, window_bounds = array<i64: 24, 64>}, {pipeline_mode = #tpu.pipeline_mode<synchronous>, transform_indices = @transform_2, window_bounds = array<i64: 1, 64>}, {pipeline_mode = #tpu.pipeline_mode<synchronous>, transform_indices = @transform_3, window_bounds = array<i64: 192, 64>}, {pipeline_mode = #tpu.pipeline_mode<synchronous>, transform_indices = @transform_4, window_bounds = array<i64: 1, 64>}, {pipeline_mode = #tpu.pipeline_mode<synchronous>, transform_indices = @transform_5, window_bounds = array<i64: 192, 64>}, {pipeline_mode = #tpu.pipeline_mode<synchronous>, transform_indices = @transform_6, window_bounds = array<i64: 1, 64>}, {pipeline_mode = #tpu.pipeline_mode<synchronous>, transform_indices = @transform_7, window_bounds = array<i64: 192, 64>}, {pipeline_mode = #tpu.pipeline_mode<synchronous>, transform_indices = @transform_8, window_bounds = array<i64: 1, 64>}, {pipeline_mode = #tpu.pipeline_mode<synchronous>, transform_indices = @transform_9, window_bounds = array<i64: 192, 32>}, {pipeline_mode = #tpu.pipeline_mode<synchronous>, transform_indices = @transform_10, window_bounds = array<i64: 1, 32>}, {transform_indices = @transform_11, window_bounds = array<i64: 64, 32>}]} {
    %0 = tpu.iota {dimensions = array<i32: 0>} : vector<64x1xi32>
    %c16_i32 = arith.constant 16 : i32
    %c0_i32 = arith.constant 0 : i32
    %1 = arith.cmpi eq, %c16_i32, %c0_i32 : i32
    %c1_i32 = arith.constant 1 : i32
    %2 = arith.select %1, %c1_i32, %c16_i32 : i32
    %3 = vector.broadcast %2 : i32 to vector<64x1xi32>
    %4 = arith.remsi %0, %3 : vector<64x1xi32>
    %c0_i32_0 = arith.constant 0 : i32
    %5 = vector.broadcast %c0_i32_0 : i32 to vector<64x1xi32>
    %6 = arith.cmpi ne, %4, %5 : vector<64x1xi32>
    %c0_i32_1 = arith.constant 0 : i32
    %7 = vector.broadcast %c0_i32_1 : i32 to vector<64x1xi32>
    %8 = arith.cmpi slt, %4, %7 : vector<64x1xi32>
    %c0_i32_2 = arith.constant 0 : i32
    %9 = arith.cmpi slt, %2, %c0_i32_2 : i32
    %10 = vector.broadcast %9 : i1 to vector<64x1xi1>
    %11 = vector.broadcast %10 : vector<64x1xi1> to vector<64x1xi1>
    %12 = arith.xori %8, %11 : vector<64x1xi1>
    %13 = arith.andi %12, %6 : vector<64x1xi1>
    %14 = vector.broadcast %2 : i32 to vector<64x1xi32>
    %15 = arith.addi %4, %14 : vector<64x1xi32>
    %16 = arith.select %13, %15, %4 : vector<64x1xi1>, vector<64x1xi32>
    %c0_i32_3 = arith.constant 0 : i32
    %17 = vector.broadcast %c0_i32_3 : i32 to vector<64x1xi32>
    %18 = arith.cmpi ne, %16, %17 : vector<64x1xi32>
    %c15_i32 = arith.constant 15 : i32
    %19 = vector.broadcast %c15_i32 : i32 to vector<64x1xi32>
    %20 = arith.cmpi ne, %16, %19 : vector<64x1xi32>
    %c0 = arith.constant 0 : index
    %c0_4 = arith.constant 0 : index
    %21 = vector.load %arg1[%c0, %c0_4] : memref<64x8xf32, #tpu.memory_space<vmem>>, vector<64x8xf32>
    %c1_i32_5 = arith.constant 1 : i32
    %22 = tpu.dynamic_rotate %21 by %c1_i32_5 dim 0 : vector<64x8xf32>, i32 -> vector<64x8xf32>
    %cst = arith.constant 0.000000e+00 : f32
    %23 = vector.shape_cast %18 : vector<64x1xi1> to vector<64x1xi1>
    %24 = vector.broadcast %23 : vector<64x1xi1> to vector<64x8xi1>
    %25 = vector.broadcast %cst : f32 to vector<64x8xf32>
    %26 = arith.select %24, %22, %25 : vector<64x8xi1>, vector<64x8xf32>
    %c63_i32 = arith.constant 63 : i32
    %27 = tpu.dynamic_rotate %21 by %c63_i32 dim 0 : vector<64x8xf32>, i32 -> vector<64x8xf32>
    %cst_6 = arith.constant 0.000000e+00 : f32
    %28 = vector.shape_cast %20 : vector<64x1xi1> to vector<64x1xi1>
    %29 = vector.broadcast %28 : vector<64x1xi1> to vector<64x8xi1>
    %30 = vector.broadcast %cst_6 : f32 to vector<64x8xf32>
    %31 = arith.select %29, %27, %30 : vector<64x8xi1>, vector<64x8xf32>
    %32 = tpu.concatenate %26, %21, %31 in 1 : vector<64x8xf32>, vector<64x8xf32>, vector<64x8xf32> -> vector<64x24xf32>
    %33 = arith.truncf %32 : vector<64x24xf32> to vector<64x24xbf16>
    %c0_7 = arith.constant 0 : index
    %c0_8 = arith.constant 0 : index
    %34 = vector.load %arg2[%c0_7, %c0_8] : memref<24x64xbf16, #tpu.memory_space<vmem>>, vector<24x64xbf16>
    %cst_9 = arith.constant dense<0.000000e+00> : vector<64x64xf32>
    %35 = tpu.matmul %33, %34, %cst_9 {dimension_numbers = #tpu.dot_dimension_numbers<[1], [0], [0], [1], [0, 0, 1, 1], [], []>} : vector<64x24xbf16>, vector<24x64xbf16>, vector<64x64xf32> -> vector<64x64xf32>
    %c0_10 = arith.constant 0 : index
    %c0_11 = arith.constant 0 : index
    %36 = vector.load %arg3[%c0_10, %c0_11] : memref<1x64xf32, #tpu.memory_space<vmem>>, vector<1x64xf32>
    %37 = vector.broadcast %36 : vector<1x64xf32> to vector<64x64xf32>
    %38 = arith.addf %35, %37 : vector<64x64xf32>
    %cst_12 = arith.constant 0.000000e+00 : f32
    %39 = vector.broadcast %cst_12 : f32 to vector<64x64xf32>
    %40 = arith.maximumf %38, %39 : vector<64x64xf32>
    %c1_i32_13 = arith.constant 1 : i32
    %41 = tpu.dynamic_rotate %40 by %c1_i32_13 dim 0 : vector<64x64xf32>, i32 -> vector<64x64xf32>
    %cst_14 = arith.constant 0.000000e+00 : f32
    %42 = vector.shape_cast %18 : vector<64x1xi1> to vector<64x1xi1>
    %43 = vector.broadcast %42 : vector<64x1xi1> to vector<64x64xi1>
    %44 = vector.broadcast %cst_14 : f32 to vector<64x64xf32>
    %45 = arith.select %43, %41, %44 : vector<64x64xi1>, vector<64x64xf32>
    %c63_i32_15 = arith.constant 63 : i32
    %46 = tpu.dynamic_rotate %40 by %c63_i32_15 dim 0 : vector<64x64xf32>, i32 -> vector<64x64xf32>
    %cst_16 = arith.constant 0.000000e+00 : f32
    %47 = vector.shape_cast %20 : vector<64x1xi1> to vector<64x1xi1>
    %48 = vector.broadcast %47 : vector<64x1xi1> to vector<64x64xi1>
    %49 = vector.broadcast %cst_16 : f32 to vector<64x64xf32>
    %50 = arith.select %48, %46, %49 : vector<64x64xi1>, vector<64x64xf32>
    %51 = tpu.concatenate %45, %40, %50 in 1 : vector<64x64xf32>, vector<64x64xf32>, vector<64x64xf32> -> vector<64x192xf32>
    %52 = arith.truncf %51 : vector<64x192xf32> to vector<64x192xbf16>
    %c0_17 = arith.constant 0 : index
    %c0_18 = arith.constant 0 : index
    %53 = vector.load %arg4[%c0_17, %c0_18] : memref<192x64xbf16, #tpu.memory_space<vmem>>, vector<192x64xbf16>
    %cst_19 = arith.constant dense<0.000000e+00> : vector<64x64xf32>
    %54 = tpu.matmul %52, %53, %cst_19 {dimension_numbers = #tpu.dot_dimension_numbers<[1], [0], [0], [1], [0, 0, 1, 1], [], []>} : vector<64x192xbf16>, vector<192x64xbf16>, vector<64x64xf32> -> vector<64x64xf32>
    %c0_20 = arith.constant 0 : index
    %c0_21 = arith.constant 0 : index
    %55 = vector.load %arg5[%c0_20, %c0_21] : memref<1x64xf32, #tpu.memory_space<vmem>>, vector<1x64xf32>
    %56 = vector.broadcast %55 : vector<1x64xf32> to vector<64x64xf32>
    %57 = arith.addf %54, %56 : vector<64x64xf32>
    %cst_22 = arith.constant 0.000000e+00 : f32
    %58 = vector.broadcast %cst_22 : f32 to vector<64x64xf32>
    %59 = arith.maximumf %57, %58 : vector<64x64xf32>
    %c1_i32_23 = arith.constant 1 : i32
    %60 = tpu.dynamic_rotate %59 by %c1_i32_23 dim 0 : vector<64x64xf32>, i32 -> vector<64x64xf32>
    %cst_24 = arith.constant 0.000000e+00 : f32
    %61 = vector.shape_cast %18 : vector<64x1xi1> to vector<64x1xi1>
    %62 = vector.broadcast %61 : vector<64x1xi1> to vector<64x64xi1>
    %63 = vector.broadcast %cst_24 : f32 to vector<64x64xf32>
    %64 = arith.select %62, %60, %63 : vector<64x64xi1>, vector<64x64xf32>
    %c63_i32_25 = arith.constant 63 : i32
    %65 = tpu.dynamic_rotate %59 by %c63_i32_25 dim 0 : vector<64x64xf32>, i32 -> vector<64x64xf32>
    %cst_26 = arith.constant 0.000000e+00 : f32
    %66 = vector.shape_cast %20 : vector<64x1xi1> to vector<64x1xi1>
    %67 = vector.broadcast %66 : vector<64x1xi1> to vector<64x64xi1>
    %68 = vector.broadcast %cst_26 : f32 to vector<64x64xf32>
    %69 = arith.select %67, %65, %68 : vector<64x64xi1>, vector<64x64xf32>
    %70 = tpu.concatenate %64, %59, %69 in 1 : vector<64x64xf32>, vector<64x64xf32>, vector<64x64xf32> -> vector<64x192xf32>
    %71 = arith.truncf %70 : vector<64x192xf32> to vector<64x192xbf16>
    %c0_27 = arith.constant 0 : index
    %c0_28 = arith.constant 0 : index
    %72 = vector.load %arg6[%c0_27, %c0_28] : memref<192x64xbf16, #tpu.memory_space<vmem>>, vector<192x64xbf16>
    %cst_29 = arith.constant dense<0.000000e+00> : vector<64x64xf32>
    %73 = tpu.matmul %71, %72, %cst_29 {dimension_numbers = #tpu.dot_dimension_numbers<[1], [0], [0], [1], [0, 0, 1, 1], [], []>} : vector<64x192xbf16>, vector<192x64xbf16>, vector<64x64xf32> -> vector<64x64xf32>
    %c0_30 = arith.constant 0 : index
    %c0_31 = arith.constant 0 : index
    %74 = vector.load %arg7[%c0_30, %c0_31] : memref<1x64xf32, #tpu.memory_space<vmem>>, vector<1x64xf32>
    %75 = vector.broadcast %74 : vector<1x64xf32> to vector<64x64xf32>
    %76 = arith.addf %73, %75 : vector<64x64xf32>
    %cst_32 = arith.constant 0.000000e+00 : f32
    %77 = vector.broadcast %cst_32 : f32 to vector<64x64xf32>
    %78 = arith.maximumf %76, %77 : vector<64x64xf32>
    %c1_i32_33 = arith.constant 1 : i32
    %79 = tpu.dynamic_rotate %78 by %c1_i32_33 dim 0 : vector<64x64xf32>, i32 -> vector<64x64xf32>
    %cst_34 = arith.constant 0.000000e+00 : f32
    %80 = vector.shape_cast %18 : vector<64x1xi1> to vector<64x1xi1>
    %81 = vector.broadcast %80 : vector<64x1xi1> to vector<64x64xi1>
    %82 = vector.broadcast %cst_34 : f32 to vector<64x64xf32>
    %83 = arith.select %81, %79, %82 : vector<64x64xi1>, vector<64x64xf32>
    %c63_i32_35 = arith.constant 63 : i32
    %84 = tpu.dynamic_rotate %78 by %c63_i32_35 dim 0 : vector<64x64xf32>, i32 -> vector<64x64xf32>
    %cst_36 = arith.constant 0.000000e+00 : f32
    %85 = vector.shape_cast %20 : vector<64x1xi1> to vector<64x1xi1>
    %86 = vector.broadcast %85 : vector<64x1xi1> to vector<64x64xi1>
    %87 = vector.broadcast %cst_36 : f32 to vector<64x64xf32>
    %88 = arith.select %86, %84, %87 : vector<64x64xi1>, vector<64x64xf32>
    %89 = tpu.concatenate %83, %78, %88 in 1 : vector<64x64xf32>, vector<64x64xf32>, vector<64x64xf32> -> vector<64x192xf32>
    %90 = arith.truncf %89 : vector<64x192xf32> to vector<64x192xbf16>
    %c0_37 = arith.constant 0 : index
    %c0_38 = arith.constant 0 : index
    %91 = vector.load %arg8[%c0_37, %c0_38] : memref<192x64xbf16, #tpu.memory_space<vmem>>, vector<192x64xbf16>
    %cst_39 = arith.constant dense<0.000000e+00> : vector<64x64xf32>
    %92 = tpu.matmul %90, %91, %cst_39 {dimension_numbers = #tpu.dot_dimension_numbers<[1], [0], [0], [1], [0, 0, 1, 1], [], []>} : vector<64x192xbf16>, vector<192x64xbf16>, vector<64x64xf32> -> vector<64x64xf32>
    %c0_40 = arith.constant 0 : index
    %c0_41 = arith.constant 0 : index
    %93 = vector.load %arg9[%c0_40, %c0_41] : memref<1x64xf32, #tpu.memory_space<vmem>>, vector<1x64xf32>
    %94 = vector.broadcast %93 : vector<1x64xf32> to vector<64x64xf32>
    %95 = arith.addf %92, %94 : vector<64x64xf32>
    %cst_42 = arith.constant 0.000000e+00 : f32
    %96 = vector.broadcast %cst_42 : f32 to vector<64x64xf32>
    %97 = arith.maximumf %95, %96 : vector<64x64xf32>
    %c1_i32_43 = arith.constant 1 : i32
    %98 = tpu.dynamic_rotate %97 by %c1_i32_43 dim 0 : vector<64x64xf32>, i32 -> vector<64x64xf32>
    %cst_44 = arith.constant 0.000000e+00 : f32
    %99 = vector.shape_cast %18 : vector<64x1xi1> to vector<64x1xi1>
    %100 = vector.broadcast %99 : vector<64x1xi1> to vector<64x64xi1>
    %101 = vector.broadcast %cst_44 : f32 to vector<64x64xf32>
    %102 = arith.select %100, %98, %101 : vector<64x64xi1>, vector<64x64xf32>
    %c63_i32_45 = arith.constant 63 : i32
    %103 = tpu.dynamic_rotate %97 by %c63_i32_45 dim 0 : vector<64x64xf32>, i32 -> vector<64x64xf32>
    %cst_46 = arith.constant 0.000000e+00 : f32
    %104 = vector.shape_cast %20 : vector<64x1xi1> to vector<64x1xi1>
    %105 = vector.broadcast %104 : vector<64x1xi1> to vector<64x64xi1>
    %106 = vector.broadcast %cst_46 : f32 to vector<64x64xf32>
    %107 = arith.select %105, %103, %106 : vector<64x64xi1>, vector<64x64xf32>
    %108 = tpu.concatenate %102, %97, %107 in 1 : vector<64x64xf32>, vector<64x64xf32>, vector<64x64xf32> -> vector<64x192xf32>
    %109 = arith.truncf %108 : vector<64x192xf32> to vector<64x192xbf16>
    %c0_47 = arith.constant 0 : index
    %c0_48 = arith.constant 0 : index
    %110 = vector.load %arg10[%c0_47, %c0_48] : memref<192x32xbf16, #tpu.memory_space<vmem>>, vector<192x32xbf16>
    %cst_49 = arith.constant dense<0.000000e+00> : vector<64x32xf32>
    %111 = tpu.matmul %109, %110, %cst_49 {dimension_numbers = #tpu.dot_dimension_numbers<[1], [0], [0], [1], [0, 0, 1, 1], [], []>} : vector<64x192xbf16>, vector<192x32xbf16>, vector<64x32xf32> -> vector<64x32xf32>
    %c0_50 = arith.constant 0 : index
    %c0_51 = arith.constant 0 : index
    %112 = vector.load %arg11[%c0_50, %c0_51] : memref<1x32xf32, #tpu.memory_space<vmem>>, vector<1x32xf32>
    %113 = vector.broadcast %112 : vector<1x32xf32> to vector<64x32xf32>
    %114 = arith.addf %111, %113 : vector<64x32xf32>
    %c0_52 = arith.constant 0 : index
    %c0_53 = arith.constant 0 : index
    %115 = vector.load %arg12[%c0_52, %c0_53] : memref<64x32xf32, #tpu.memory_space<vmem>>, vector<64x32xf32>
    tpu.vector_store %arg12[%c0_52, %c0_53], %114 {strides = array<i32>} : memref<64x32xf32, #tpu.memory_space<vmem>>, vector<64x32xf32>,
    return
  }
  func.func @transform_0(%arg0: i32) -> (i32, i32) {
    %c0_i32 = arith.constant 0 : i32
    %c0_i32_0 = arith.constant 0 : i32
    return %arg0, %c0_i32 : i32, i32
  }
  func.func @transform_1(%arg0: i32) -> (i32, i32) {
    %c0_i32 = arith.constant 0 : i32
    %c0_i32_0 = arith.constant 0 : i32
    %c0_i32_1 = arith.constant 0 : i32
    return %c0_i32, %c0_i32_0 : i32, i32
  }
  func.func @transform_2(%arg0: i32) -> (i32, i32) {
    %c0_i32 = arith.constant 0 : i32
    %c0_i32_0 = arith.constant 0 : i32
    %c0_i32_1 = arith.constant 0 : i32
    return %c0_i32, %c0_i32_0 : i32, i32
  }
  func.func @transform_3(%arg0: i32) -> (i32, i32) {
    %c0_i32 = arith.constant 0 : i32
    %c0_i32_0 = arith.constant 0 : i32
    %c0_i32_1 = arith.constant 0 : i32
    return %c0_i32, %c0_i32_0 : i32, i32
  }
  func.func @transform_4(%arg0: i32) -> (i32, i32) {
    %c0_i32 = arith.constant 0 : i32
    %c0_i32_0 = arith.constant 0 : i32
    %c0_i32_1 = arith.constant 0 : i32
    return %c0_i32, %c0_i32_0 : i32, i32
  }
  func.func @transform_5(%arg0: i32) -> (i32, i32) {
    %c0_i32 = arith.constant 0 : i32
    %c0_i32_0 = arith.constant 0 : i32
    %c0_i32_1 = arith.constant 0 : i32
    return %c0_i32, %c0_i32_0 : i32, i32
  }
  func.func @transform_6(%arg0: i32) -> (i32, i32) {
    %c0_i32 = arith.constant 0 : i32
    %c0_i32_0 = arith.constant 0 : i32
    %c0_i32_1 = arith.constant 0 : i32
    return %c0_i32, %c0_i32_0 : i32, i32
  }
  func.func @transform_7(%arg0: i32) -> (i32, i32) {
    %c0_i32 = arith.constant 0 : i32
    %c0_i32_0 = arith.constant 0 : i32
    %c0_i32_1 = arith.constant 0 : i32
    return %c0_i32, %c0_i32_0 : i32, i32
  }
  func.func @transform_8(%arg0: i32) -> (i32, i32) {
    %c0_i32 = arith.constant 0 : i32
    %c0_i32_0 = arith.constant 0 : i32
    %c0_i32_1 = arith.constant 0 : i32
    return %c0_i32, %c0_i32_0 : i32, i32
  }
  func.func @transform_9(%arg0: i32) -> (i32, i32) {
    %c0_i32 = arith.constant 0 : i32
    %c0_i32_0 = arith.constant 0 : i32
    %c0_i32_1 = arith.constant 0 : i32
    return %c0_i32, %c0_i32_0 : i32, i32
  }
  func.func @transform_10(%arg0: i32) -> (i32, i32) {
    %c0_i32 = arith.constant 0 : i32
    %c0_i32_0 = arith.constant 0 : i32
    %c0_i32_1 = arith.constant 0 : i32
    return %c0_i32, %c0_i32_0 : i32, i32
  }
  func.func @transform_11(%arg0: i32) -> (i32, i32) {
    %c0_i32 = arith.constant 0 : i32
    %c0_i32_0 = arith.constant 0 : i32
    return %arg0, %c0_i32 : i32, i32
  }
}

</mosaic_0001>

<bundles_post_ra>
// kernel: tpu_custom_call.1
= control target key start
LH: loop header
LB: loop body
LE: loop exit
PB: predicated region body
PF: predicated region fallthrough
CT: control target
= control target key end

     0   :  { %s2350_s17 = smov 0   ;;  %s3085_s0 = inlined_call_operand.vmem [shape: f32[128,8], index: 0, kind: input, shape index: {}]   ;;  %s3086_s1 = inlined_call_operand.vmem [shape: bf16[24,64], index: 1, kind: input, shape index: {}]   ;;  %s3087_s2 = inlined_call_operand.vmem [shape: f32[1,64], index: 2, kind: input, shape index: {}]   ;;  %s3088_s3 = inlined_call_operand.vmem [shape: bf16[192,64], index: 3, kind: input, shape index: {}]   ;;  %s3089_s4 = inlined_call_operand.vmem [shape: f32[1,64], index: 4, kind: input, shape index: {}]   ;;  %s3090_s5 = inlined_call_operand.vmem [shape: bf16[192,64], index: 5, kind: input, shape index: {}]   ;;  %s3091_s6 = inlined_call_operand.vmem [shape: f32[1,64], index: 6, kind: input, shape index: {}]   ;;  %s3092_s7 = inlined_call_operand.vmem [shape: bf16[192,64], index: 7, kind: input, shape index: {}]   ;;  %s3093_s8 = inlined_call_operand.vmem [shape: f32[1,64], index: 8, kind: input, shape index: {}]   ;;  %s3094_s9 = inlined_call_operand.vmem [shape: bf16[192,32], index: 9, kind: input, shape index: {}]   ;;  %s3095_s10 = inlined_call_operand.vmem [shape: f32[1,32], index: 10, kind: input, shape index: {}]   ;;  %s3096_s11 = inlined_call_operand.vmem [shape: f32[128,32], index: 11, kind: output, shape index: {}]  }
   0x1 LB: > { %s1991_s18 = sadd.s32 4294967295, %s2284_s17   ;;  %p1995_p0 = scmp.ge.s32.totalorder %s2284_s17, 1  ;;  %s2284_s17 = sphi %s2350_s17, %s21_s17  }
   0x2   : > { %p338_p1 = scmp.lt.s32.totalorder %s2284_s17, 3 }
   0x4   : > { %p339_p2 = pnand %p1995_p0, %p338_p1 }
   0x5   : > { %s1996_s19 = sshll.u32 (!%p339_p2), %s1991_s18, 3  ;;  %v391_v0 = vlaneseq (!%p339_p2)  ;;  %v2228_v1 = vld [vmem:[%s3086_s1] sm:$0xff] (!%p339_p2)   ;;  %v2373_v7 = vld [vmem:[%s3086_s1 + $0x8] ss:$0 sps:$4 sm:$0xff] (!%p339_p2)   ;;  %vm720_vm0 = vcmask (!%p339_p2), 1043456   ;;  %s2286_s28 = smov (!%p339_p2), 8  }
   0x6   : > { %342 = sbr.rel (%p339_p2) target bundleno = 1750 (0x6d6), region = 64  ;;  %p379_p3 = scmp.lt.s32.totalorder (!%p339_p2), %s1996_s19, 15  ;;  %2083 = vmatprep.subr.bf16.mxu0 (!%p339_p2), %v2228_v1  ;;  %v722_v60 = vsel (!%p339_p2), %vm720_vm0, %v2373_v7, 0  ;;  %vm666_vm8 = vcmask (!%p339_p2), 64512   ;;  %vm675_vm10 = vcmask (!%p339_p2), 130048   ;;  %vm707_vm12 = vcmask (!%p339_p2), 195584  }
   0x7   : > { %v2361_v2 = vshrl.u32 (!%p339_p2), %v391_v0, 7  ;;  %2084 = vmatpush3.bf16.msra.mxu0 (!%p339_p2), %v2228_v1  ;;  %s2287_s29 = smov (!%p339_p2), 16   ;;  %s2289_s24 = smov (!%p339_p2), 64   ;;  %vm877_vm14 = vcmask (!%p339_p2), 523264   ;;  %vm1926_vm15 = vcmask (!%p339_p2), 261120  }
   0x8   : > { %2095 = vmatprep.subr.msk.bf16.mxu0 (!%p339_p2), %vm720_vm0, %v2373_v7 }
   0x9   : > { %v393_v3 = vadd.s32 (!%p339_p2), 8, %v2361_v2  ;;  %v395_v4 = vadd.s32 (!%p339_p2), 24, %v2361_v2  ;;  %v397_v5 = vadd.s32 (!%p339_p2), 40, %v2361_v2  ;;  %v399_v6 = vadd.s32 (!%p339_p2), 56, %v2361_v2 }
   0xa   : > { %vm569_vm1 = vcmp.lt.s32.totalorder (!%p339_p2), %v2361_v2, 7  ;;  %vm528_vm2 = vcmp.lt.s32.totalorder (!%p339_p2), %v2361_v2, 1  ;;  %v404_v7 = vand.u32 (!%p339_p2), 15, %v2361_v2 }
   0xb   : > { %v411_v8 = vand.u32 (!%p339_p2), 15, %v393_v3  ;;  %v425_v12 = vand.u32 (!%p339_p2), 15, %v395_v4  ;;  %v439_v13 = vand.u32 (!%p339_p2), 15, %v397_v5  ;;  %v453_v19 = vand.u32 (!%p339_p2), 15, %v399_v6  ;;  %2086 = vmatpush3.bf16.msra.mxu0 (!%p339_p2), %v722_v60 }
   0xc   : > { %v394_v6 = vadd.s32 (!%p339_p2), 16, %v2361_v2  ;;  %vm2457_vm7 = vcmp.ne.s32.totalorder (!%p339_p2), %v404_v7, 0  ;;  %v2230_v7 = vld [vmem:[%s3088_s3] sm:$0xff] (!%p339_p2)  }
   0xd   : > { %s3114_s19 = smov (!%p379_p3, %s1996_s19), 15  ;;  %vm2384_vm3 = vcmp.ne.s32.totalorder %v411_v8, 15  ;;  %vm2393_vm4 = vcmp.ne.s32.totalorder %v425_v12, 15  ;;  %vm2407_vm5 = vcmp.ne.s32.totalorder %v439_v13, 15  ;;  %vm2415_vm6 = vcmp.ne.s32.totalorder %v453_v19, 15 }
   0xe   : > { %s1997_s22 = sshll.u32 %s3114_s19, 3  ;;  %v396_v8 = vadd.s32 32, %v2361_v2 }
   0xf   : > { %s382_s27 = scalar_lea.vmem %s3085_s0, %s1997_s22  ;;  %s3064_s12 = scalar_lea.vmem %s3096_s11, %s1997_s22 }
  0x10   : > { %v512_v9 = vld [vmem:[%s382_s27] sm:$0xff]  ;;  %v513_v10 = vld [vmem:[%s382_s27 + $0x8] sm:$0xff]  ;;  %v514_v11 = vld [vmem:[%s382_s27 + $0x10] sm:$0xff]  ;;  %v432_v12 = vand.u32 15, %v396_v8  ;;  %v2288_v8 = vmov 0  }
  0x11   : > { %v521_v14 = vrot.slane %v513_v10, 7  ;;  %v562_v15 = vrot.slane %v513_v10, 1  ;;  %v2108_v16 = vpack.i.bf16 %v513_v10, %v512_v9  ;;  %v515_v17 = vld [vmem:[%s382_s27 + $0x18] sm:$0xff]  ;;  %v516_v18 = vld [vmem:[%s382_s27 + $0x20] sm:$0xff]  ;;  %v520_v20 = vrot.slane %v512_v9, 7  ;;  %v517_v24 = vld [vmem:[%s382_s27 + $0x28] sm:$0xff]  ;;  %1009 = vmatprep.subr.bf16.mxu1 %v2288_v8  ;;  %1293 = vmatprep.subr.bf16.mxu0 %v2288_v8 }
  0x12   : > { %v561_v21 = vrot.slane %v512_v9, 1  ;;  %v563_v23 = vrot.slane %v514_v11, 1  ;;  %v522_v25 = vrot.slane %v514_v11, 7  ;;  %v564_v26 = vrot.slane %v515_v17, 1  ;;  %v518_v28 = vld [vmem:[%s382_s27 + $0x30] sm:$0xff]  ;;  %v519_v29 = vld [vmem:[%s382_s27 + $0x38] sm:$0xff]  ;;  %1010 = vmatpush1.bf16.msra.mxu1 %v2230_v7 }
  0x13   : > { %2109 = vrot.lane.b32.xlu0 %v2108_v16, %s2286_s28  ;;  %v2113_v27 = vpack.i.bf16 %v515_v17, %v514_v11  ;;  %v565_v33 = vrot.slane %v516_v18, 1  ;;  %v566_v36 = vrot.slane %v517_v24, 1  ;;  %v523_v38 = vrot.slane %v515_v17, 7  ;;  %1011 = vmatprep.subr.bf16.mxu1 %v2288_v8 }
  0x14   : > { %v575_v30 = vsel %vm569_vm1, %v562_v15, %v563_v23  ;;  %v576_v31 = vsel %vm569_vm1, %v561_v21, %v562_v15  ;;  %v574_v35 = vsel %vm569_vm1, %v563_v23, %v564_v26  ;;  %v568_v40 = vrot.slane %v519_v29, 1 }
  0x15   : > { %v595_v34 = vsel %vm2384_vm3, %v575_v30, 0.0  ;;  %v573_v39 = vsel %vm569_vm1, %v564_v26, %v565_v33  ;;  %v525_v42 = vrot.slane %v517_v24, 7  ;;  %v2128_v43 = vpack.i.bf16 %v517_v24, %v516_v18 }
  0x16   : > { %v2118_v37 = vpack.i.bf16 %v595_v34, %v576_v31  ;;  %v597_v41 = vsel %vm2393_vm4, %v573_v39, 0.0  ;;  %v567_v44 = vrot.slane %v518_v28, 1  ;;  %v527_v46 = vrot.slane %v519_v29, 7 }
  0x17   : > { %2114 = vrot.lane.b32.xlu0 %v2113_v27, %s2286_s28  ;;  %v2123_v45 = vpack.i.bf16 %v597_v41, %v574_v35  ;;  %v572_v48 = vsel %vm569_vm1, %v565_v33, %v566_v36  ;;  %v526_v49 = vrot.slane %v518_v28, 7  ;;  %v577_v53 = vsel %vm569_vm1, %v568_v40, %v561_v21 }
  0x18   : > { %2119 = vrot.lane.b32.xlu1 %v2118_v37, %s2287_s29  ;;  %v571_v50 = vsel %vm569_vm1, %v566_v36, %v567_v44  ;;  %v533_v54 = vsel %vm528_vm2, %v522_v25, %v523_v38  ;;  %v534_v55 = vsel %vm528_vm2, %v521_v14, %v522_v25  ;;  %v2133_v57 = vpack.i.bf16 %v519_v29, %v518_v28 }
  0x19   : > { %v599_v52 = vsel %vm2407_vm5, %v571_v50, 0.0  ;;  %v535_v58 = vsel %vm528_vm2, %v520_v20, %v521_v14  ;;  %v536_v59 = vsel %vm528_vm2, %v527_v46, %v520_v20  ;;  %v570_v61 = vsel %vm569_vm1, %v567_v44, %v568_v40 }
  0x1a   : > { %v2138_v56 = vpack.i.bf16 %v599_v52, %v572_v48  ;;  %v601_v62 = vsel %vm2415_vm6, %v577_v53, 0.0  ;;  %v524_v63 = vrot.slane %v516_v18, 7  ;;  %v2441_v0 = vsel %vm528_vm2, %v526_v49, %v527_v46 }
  0x1b   : > { %2129 = vrot.lane.b32.xlu0 %v2128_v43, %s2286_s28  ;;  %v2445_v1 = vsel %vm528_vm2, %v525_v42, %v526_v49  ;;  %v2143_v5 = vpack.i.bf16 %v601_v62, %v570_v61  ;;  %v418_v9 = vand.u32 15, %v394_v6  ;;  %v553_v15 = vsel %vm2457_vm7, %v536_v59, 0.0 }
  0x1c   : > { %2124 = vrot.lane.b32.xlu1 %v2123_v45, %s2287_s29  ;;  %v531_v3 = vsel %vm528_vm2, %v524_v63, %v525_v42  ;;  %v532_v4 = vsel %vm528_vm2, %v523_v38, %v524_v63  ;;  %v398_v17 = vadd.s32 48, %v2361_v2  ;;  %vm2468_vm11 = vcmp.ne.s32.totalorder %v432_v12, 0  ;;  %v2234_v12 = vld [vmem:[%s3088_s3 + $0x20] sm:$0xff]  }
  0x1d   : > { %vm2463_vm9 = vcmp.ne.s32.totalorder %v418_v9, 0  ;;  %v557_v34 = vsel %vm2468_vm11, %v532_v4, 0.0  ;;  %v2232_v9 = vld [vmem:[%s3088_s3 + $0x10] sm:$0xff]  }
  0x1e   : > { %v555_v28 = vsel %vm2463_vm9, %v534_v55, 0.0  ;;  %v446_v29 = vand.u32 15, %v398_v17  ;;  %v2238_v17 = vld [vmem:[%s3088_s3 + $0x40] sm:$0xff]  }
  0x1f   : > { %2139 = vrot.lane.b32.xlu0 %v2138_v56, %s2287_s29 }
  0x20   : > { %2134 = vrot.lane.b32.xlu1 %v2133_v57, %s2286_s28  ;;  %vm2483_vm13 = vcmp.ne.s32.totalorder %v446_v29, 0 }
  0x21   : > { %v559_v55 = vsel %vm2483_vm13, %v2445_v1, 0.0 }
  0x24   : > { %2144 = vrot.lane.b32.xlu1 %v2143_v5, %s2287_s29 }
  0x85   : > { %v2110_v11 = vpop.permute.xlu0 %2109 }
  0x86   : > { %v2112_v13 = vunpack.i.h.bf16 %v2110_v11  ;;  %v2111_v14 = vunpack.i.l.bf16 %v2110_v11  ;;  %v2233_v11 = vld [vmem:[%s3088_s3 + $0x18] sm:$0xff]  }
  0x88   : > { %v667_v24 = vsel %vm666_vm8, %v553_v15, %v2111_v14  ;;  %v668_v25 = vsel %vm666_vm8, %v535_v58, %v2112_v13  ;;  %v2235_v13 = vld [vmem:[%s3088_s3 + $0x28] sm:$0xff]   ;;  %v2236_v14 = vld [vmem:[%s3088_s3 + $0x30] sm:$0xff]   ;;  %v2237_v15 = vld [vmem:[%s3088_s3 + $0x38] sm:$0xff]  }
  0x89   : > { %v2115_v18 = vpop.permute.xlu0 %2114 }
  0x8a   : > { %v2120_v20 = vpop.permute.xlu1 %2119  ;;  %v2117_v21 = vunpack.i.h.bf16 %v2115_v18  ;;  %v2116_v23 = vunpack.i.l.bf16 %v2115_v18  ;;  %v2239_v18 = vld [vmem:[%s3088_s3 + $0x48] sm:$0xff]  }
  0x8b   : > { %v2122_v26 = vunpack.i.h.bf16 %v2120_v20  ;;  %v2121_v27 = vunpack.i.l.bf16 %v2120_v20  ;;  %v2240_v20 = vld [vmem:[%s3088_s3 + $0x50] sm:$0xff]  }
  0x8c   : > { %v670_v30 = vsel %vm666_vm8, %v533_v54, %v2117_v21  ;;  %v669_v36 = vsel %vm666_vm8, %v555_v28, %v2116_v23  ;;  %v2241_v21 = vld [vmem:[%s3088_s3 + $0x58] sm:$0xff]   ;;  %v2000_v23 = vld [vmem:[%s3087_s2] ss:$0 sm:$0xff] }
  0x8d   : > { %v676_v31 = vsel %vm675_vm10, %v667_v24, %v2121_v27  ;;  %v677_v33 = vsel %vm675_vm10, %v668_v25, %v2122_v26  ;;  %v2130_v35 = vpop.permute.xlu0 %2129 }
  0x8e   : > { %v2125_v37 = vpop.permute.xlu1 %2124  ;;  %v684_v38 = vpack.c.bf16 %v677_v33, %v676_v31  ;;  %v2132_v39 = vunpack.i.h.bf16 %v2130_v35  ;;  %v2131_v40 = vunpack.i.l.bf16 %v2130_v35 }
  0x8f   : > { %v2127_v41 = vunpack.i.h.bf16 %v2125_v37  ;;  %v2126_v42 = vunpack.i.l.bf16 %v2125_v37 }
  0x90   : > { %2087 = vmatprep.mubr.msk.bf16.mxu0 %vm707_vm12, %v684_v38  ;;  %v672_v46 = vsel %vm666_vm8, %v531_v3, %v2132_v39  ;;  %v671_v48 = vsel %vm666_vm8, %v557_v34, %v2131_v40 }
  0x91   : > { %v679_v44 = vsel %vm675_vm10, %v670_v30, %v2127_v41  ;;  %v678_v45 = vsel %vm675_vm10, %v669_v36, %v2126_v42  ;;  %v2140_v49 = vpop.permute.xlu0 %2139 }
  0x92   : > { %v685_v50 = vpack.c.bf16 %v679_v44, %v678_v45  ;;  %v2135_v52 = vpop.permute.xlu1 %2134  ;;  %v2142_v53 = vunpack.i.h.bf16 %v2140_v49  ;;  %v2141_v54 = vunpack.i.l.bf16 %v2140_v49 }
  0x93   : > { %v2137_v56 = vunpack.i.h.bf16 %v2135_v52  ;;  %v2136_v57 = vunpack.i.l.bf16 %v2135_v52 }
  0x94   : > { %2088 = vmatmul.mubr.msk.bf16.vlgmr.msra.gmra.mrb[0].mxu0 %vm707_vm12, %v685_v50  ;;  %v680_v58 = vsel %vm675_vm10, %v671_v48, %v2141_v54  ;;  %v681_v59 = vsel %vm675_vm10, %v672_v46, %v2142_v53 }
  0x95   : > { %v686_v60 = vpack.c.bf16 %v681_v59, %v680_v58  ;;  %v674_v61 = vsel %vm666_vm8, %v2441_v0, %v2137_v56  ;;  %v673_v62 = vsel %vm666_vm8, %v559_v55, %v2136_v57  ;;  %v2231_v0 = vld [vmem:[%s3088_s3 + $0x8] sm:$0xff]  }
  0x96   : > { %v2145_v63 = vpop.permute.xlu1 %2144  ;;  %1012 = vmatpush1.bf16.msra.mxu1 %v2231_v0 }
  0x97   : > { %v2147_v3 = vunpack.i.h.bf16 %v2145_v63  ;;  %v2146_v4 = vunpack.i.l.bf16 %v2145_v63  ;;  %2091 = vmatprep.mubr.msk.bf16.mxu0 %vm707_vm12, %v686_v60  ;;  %1013 = vmatprep.subr.bf16.mxu1 %v2288_v8 }
  0x99   : > { %v682_v1 = vsel %vm675_vm10, %v673_v62, %v2146_v4  ;;  %v683_v5 = vsel %vm675_vm10, %v674_v61, %v2147_v3 }
  0x9a   : > { %v687_v6 = vpack.c.bf16 %v683_v5, %v682_v1  ;;  %1014 = vmatpush1.bf16.msra.mxu1 %v2232_v9 }
  0x9b   : > { %1015 = vmatprep.subr.bf16.mxu1 %v2288_v8 }
  0x9c   : > { %2092 = vmatmul.mubr.msk.bf16.gmra.mrb[4].mxu0 %vm707_vm12, %v687_v6 }
  0x9e   : > { %1016 = vmatpush1.bf16.msra.mxu1 %v2233_v11 }
  0x9f   : > { %1017 = vmatprep.subr.bf16.mxu1 %v2288_v8 }
  0xa2   : > { %1018 = vmatpush1.bf16.msra.mxu1 %v2234_v12 }
  0xa3   : > { %1019 = vmatprep.subr.bf16.mxu1 %v2288_v8 }
  0xa6   : > { %1020 = vmatpush1.bf16.msra.mxu1 %v2235_v13 }
  0xa7   : > { %1021 = vmatprep.subr.bf16.mxu1 %v2288_v8 }
  0xaa   : > { %1022 = vmatpush1.bf16.msra.mxu1 %v2236_v14 }
  0xab   : > { %1023 = vmatprep.subr.bf16.mxu1 %v2288_v8 }
  0xae   : > { %1024 = vmatpush1.bf16.msra.mxu1 %v2237_v15 }
  0xaf   : > { %1025 = vmatprep.subr.bf16.mxu1 %v2288_v8 }
  0xb2   : > { %1026 = vmatpush1.bf16.msra.mxu1 %v2238_v17 }
  0xb3   : > { %1027 = vmatprep.subr.bf16.mxu1 %v2288_v8 }
  0xb6   : > { %1028 = vmatpush1.bf16.msra.mxu1 %v2239_v18 }
  0xb7   : > { %1029 = vmatprep.subr.bf16.mxu1 %v2288_v8 }
  0xba   : > { %1030 = vmatpush1.bf16.msra.mxu1 %v2240_v20 }
  0xbb   : > { %1031 = vmatprep.subr.bf16.mxu1 %v2288_v8 }
  0xbe   : > { %1032 = vmatpush1.bf16.msra.mxu1 %v2241_v21 }
  0xbf   : > { %1577 = vmatprep.subr.bf16.mxu1 %v2288_v8 }
 0x167   : > { %v2089_v24 = vpop.f32.mrb[0].mxu0 }
 0x168   : > { %v767_v25 = vadd.f32 %v2089_v24, %v2000_v23  ;;  %v758_v26 = vpop.f32.mrb[1].mxu0 }
 0x169   : > { %v759_v27 = vadd.f32 %v2000_v23, %v758_v26  ;;  %v2090_v28 = vpop.f32.mrb[2].mxu0 }
 0x16a   : > { %v791_v29 = vmax.f32 %v767_v25, 0.0  ;;  %v770_v30 = vadd.f32 %v2090_v28, %v2000_v23  ;;  %v761_v31 = vpop.f32.mrb[3].mxu0 }
 0x16b   : > { %v2557_v33 = vmax.f32 %v759_v27, 0.0  ;;  %v762_v34 = vadd.f32 %v2000_v23, %v761_v31 }
 0x16c   : > { %v792_v35 = vmax.f32 %v770_v30, 0.0  ;;  %v799_v36 = vrot.slane %v791_v29, 7  ;;  %v823_v37 = vrot.slane %v791_v29, 1 }
 0x16d   : > { %v790_v38 = vmax.f32 %v762_v34, 0.0  ;;  %v797_v39 = vrot.slane %v2557_v33, 7  ;;  %v821_v44 = vrot.slane %v2557_v33, 1 }
 0x16e   : > { %v800_v40 = vrot.slane %v792_v35, 7  ;;  %v824_v41 = vrot.slane %v792_v35, 1  ;;  %v2153_v42 = vpack.i.bf16 %v792_v35, %v791_v29 }
 0x16f   : > { %v798_v45 = vrot.slane %v790_v38, 7  ;;  %v822_v46 = vrot.slane %v790_v38, 1  ;;  %v2093_v48 = vpop.f32.mrb[4].mxu0  ;;  %v2148_v49 = vpack.i.bf16 %v790_v38, %v2557_v33 }
 0x170   : > { %v783_v50 = vadd.f32 %v2093_v48, %v2000_v23  ;;  %2154 = vrot.lane.b32.xlu1 %v2153_v42, %s2289_s24  ;;  %v774_v52 = vpop.f32.mrb[5].mxu0  ;;  %v833_v53 = vsel %vm569_vm1, %v823_v37, %v824_v41  ;;  %v809_v54 = vsel %vm528_vm2, %v799_v36, %v800_v40 }
 0x171   : > { %v775_v55 = vadd.f32 %v2000_v23, %v774_v52  ;;  %v2094_v56 = vpop.f32.mrb[6].mxu0  ;;  %2149 = vrot.lane.b32.xlu0 %v2148_v49, %s2289_s24  ;;  %v834_v57 = vsel %vm569_vm1, %v822_v46, %v823_v37  ;;  %v835_v58 = vsel %vm569_vm1, %v821_v44, %v822_v46  ;;  %v811_v59 = vsel %vm528_vm2, %v797_v39, %v798_v45 }
 0x172   : > { %v795_v60 = vmax.f32 %v783_v50, 0.0  ;;  %v786_v61 = vadd.f32 %v2094_v56, %v2000_v23  ;;  %v777_v62 = vpop.f32.mrb[7].mxu0  ;;  %v838_v63 = vsel %vm2384_vm3, %v834_v57, 0.0  ;;  %v810_v3 = vsel %vm528_vm2, %v798_v45, %v799_v36 }
 0x173   : > { %v793_v4 = vmax.f32 %v775_v55, 0.0  ;;  %v778_v1 = vadd.f32 %v2000_v23, %v777_v62  ;;  %v887_v5 = vpack.c.bf16 %v838_v63, %v835_v58 }
 0x174   : > { %v827_v6 = vrot.slane %v795_v60, 1  ;;  %v796_v7 = vmax.f32 %v786_v61, 0.0  ;;  %v803_v12 = vrot.slane %v795_v60, 7 }
 0x175   : > { %v801_v0 = vrot.slane %v793_v4, 7  ;;  %v825_v9 = vrot.slane %v793_v4, 1  ;;  %v794_v11 = vmax.f32 %v778_v1, 0.0  ;;  %2020 = vmatprep.mubr.msk.bf16.mxu1 %vm877_vm14, %v887_v5 }
 0x176   : > { %v804_v13 = vrot.slane %v796_v7, 7  ;;  %v828_v14 = vrot.slane %v796_v7, 1  ;;  %v2163_v15 = vpack.i.bf16 %v796_v7, %v795_v60 }
 0x177   : > { %v802_v17 = vrot.slane %v794_v11, 7  ;;  %v826_v18 = vrot.slane %v794_v11, 1  ;;  %v2158_v20 = vpack.i.bf16 %v794_v11, %v793_v4  ;;  %v832_v21 = vsel %vm569_vm1, %v824_v41, %v825_v9  ;;  %v2244_v11 = vld [vmem:[%s3090_s5 + $0x10] sm:$0xff]  }
 0x178   : > { %2164 = vrot.lane.b32.xlu1 %v2163_v15, %s2289_s24  ;;  %v812_v23 = vsel %vm528_vm2, %v804_v13, %v797_v39  ;;  %v840_v24 = vsel %vm2393_vm4, %v832_v21, 0.0  ;;  %v808_v25 = vsel %vm528_vm2, %v800_v40, %v801_v0  ;;  %v829_v26 = vsel %vm569_vm1, %v827_v6, %v828_v14  ;;  %v2248_v15 = vld [vmem:[%s3090_s5 + $0x30] sm:$0xff]  }
 0x179   : > { %2159 = vrot.lane.b32.xlu0 %v2158_v20, %s2289_s24  ;;  %v889_v27 = vpack.c.bf16 %v840_v24, %v833_v53  ;;  %v830_v28 = vsel %vm569_vm1, %v826_v18, %v827_v6  ;;  %v831_v29 = vsel %vm569_vm1, %v825_v9, %v826_v18  ;;  %v807_v31 = vsel %vm528_vm2, %v801_v0, %v802_v17  ;;  %v2242_v0 = vld [vmem:[%s3090_s5] sm:$0xff]   ;;  %v2243_v9 = vld [vmem:[%s3090_s5 + $0x8] sm:$0xff]   ;;  %v2252_v21 = vld [vmem:[%s3090_s5 + $0x50] sm:$0xff]  }
 0x17a   : > { %v842_v30 = vsel %vm2407_vm5, %v830_v28, 0.0  ;;  %v836_v33 = vsel %vm569_vm1, %v828_v14, %v821_v44  ;;  %v805_v36 = vsel %vm528_vm2, %v803_v12, %v804_v13  ;;  %v806_v37 = vsel %vm528_vm2, %v802_v17, %v803_v12  ;;  %1294 = vmatpush1.bf16.msra.mxu0 %v2242_v0  ;;  %v2245_v12 = vld [vmem:[%s3090_s5 + $0x18] sm:$0xff]   ;;  %v2246_v13 = vld [vmem:[%s3090_s5 + $0x20] sm:$0xff]   ;;  %v2247_v14 = vld [vmem:[%s3090_s5 + $0x28] sm:$0xff]  }
 0x17b   : > { %v891_v34 = vpack.c.bf16 %v842_v30, %v831_v29  ;;  %v844_v35 = vsel %vm2415_vm6, %v836_v33, 0.0  ;;  %v815_v44 = vsel %vm2463_vm9, %v810_v3, 0.0  ;;  %v813_v48 = vsel %vm2457_vm7, %v812_v23, 0.0  ;;  %1295 = vmatprep.subr.bf16.mxu0 %v2288_v8  ;;  %v2249_v17 = vld [vmem:[%s3090_s5 + $0x38] sm:$0xff]   ;;  %v2250_v18 = vld [vmem:[%s3090_s5 + $0x40] sm:$0xff]   ;;  %v2251_v20 = vld [vmem:[%s3090_s5 + $0x48] sm:$0xff]  }
 0x17c   : > { %v893_v38 = vpack.c.bf16 %v844_v35, %v829_v26  ;;  %v819_v3 = vsel %vm2483_vm13, %v806_v37, 0.0  ;;  %v2673_v23 = vld [vmem:[%s3089_s4] ss:$0 sm:$0xff]  ;;  %v2253_v24 = vld [vmem:[%s3090_s5 + $0x58] sm:$0xff]  }
 0x17e   : > { %1296 = vmatpush1.bf16.msra.mxu0 %v2243_v9 }
 0x17f   : > { %1297 = vmatprep.subr.bf16.mxu0 %v2288_v8 }
 0x182   : > { %1298 = vmatpush1.bf16.msra.mxu0 %v2244_v11 }
 0x183   : > { %1299 = vmatprep.subr.bf16.mxu0 %v2288_v8 }
 0x186   : > { %1300 = vmatpush1.bf16.msra.mxu0 %v2245_v12 }
 0x187   : > { %1301 = vmatprep.subr.bf16.mxu0 %v2288_v8 }
 0x18a   : > { %1302 = vmatpush1.bf16.msra.mxu0 %v2246_v13 }
 0x18b   : > { %1303 = vmatprep.subr.bf16.mxu0 %v2288_v8 }
 0x18e   : > { %1304 = vmatpush1.bf16.msra.mxu0 %v2247_v14 }
 0x18f   : > { %1305 = vmatprep.subr.bf16.mxu0 %v2288_v8 }
 0x192   : > { %1306 = vmatpush1.bf16.msra.mxu0 %v2248_v15 }
 0x193   : > { %1307 = vmatprep.subr.bf16.mxu0 %v2288_v8 }
 0x196   : > { %1308 = vmatpush1.bf16.msra.mxu0 %v2249_v17 }
 0x197   : > { %1309 = vmatprep.subr.bf16.mxu0 %v2288_v8 }
 0x19a   : > { %1310 = vmatpush1.bf16.msra.mxu0 %v2250_v18 }
 0x19b   : > { %1311 = vmatprep.subr.bf16.mxu0 %v2288_v8 }
 0x19e   : > { %1312 = vmatpush1.bf16.msra.mxu0 %v2251_v20 }
 0x19f   : > { %1313 = vmatprep.subr.bf16.mxu0 %v2288_v8 }
 0x1a2   : > { %1314 = vmatpush1.bf16.msra.mxu0 %v2252_v21 }
 0x1a3   : > { %1315 = vmatprep.subr.bf16.mxu0 %v2288_v8 }
 0x1a6   : > { %1316 = vmatpush1.bf16.msra.mxu0 %v2253_v24 }
 0x1a7   : > { %1861 = vmatprep.subr.bf16.mxu0 %v2288_v8 }
 0x1e2   : > { %v2155_v39 = vpop.permute.xlu1 %2154 }
 0x1e3   : > { %v2157_v40 = vunpack.i.h.bf16 %v2155_v39  ;;  %v2156_v41 = vunpack.i.l.bf16 %v2155_v39  ;;  %v2150_v42 = vpop.permute.xlu0 %2149 }
 0x1e4   : > { %v2152_v45 = vunpack.i.h.bf16 %v2150_v42  ;;  %v2151_v46 = vunpack.i.l.bf16 %v2150_v42 }
 0x1e5   : > { %v880_v49 = vsel %vm877_vm14, %v815_v44, %v2156_v41  ;;  %v881_v50 = vsel %vm877_vm14, %v809_v54, %v2157_v40  ;;  %v817_v54 = vsel %vm2468_vm11, %v808_v25, 0.0 }
 0x1e6   : > { %v878_v52 = vsel %vm877_vm14, %v813_v48, %v2151_v46  ;;  %v879_v53 = vsel %vm877_vm14, %v811_v59, %v2152_v45  ;;  %v888_v55 = vpack.c.bf16 %v881_v50, %v880_v49 }
 0x1e7   : > { %v886_v56 = vpack.c.bf16 %v879_v53, %v878_v52 }
 0x1e9   : > { %1042 = vmatmul.mubr.bf16.vlgmr.msra.gmra.mrb[0].mxu1 %v886_v56 }
 0x1ea   : > { %v2165_v57 = vpop.permute.xlu1 %2164  ;;  %2021 = vmatprep.mubr.msk.bf16.mxu1 %vm877_vm14, %v889_v27 }
 0x1eb   : > { %v2167_v58 = vunpack.i.h.bf16 %v2165_v57  ;;  %v2166_v60 = vunpack.i.l.bf16 %v2165_v57  ;;  %v2160_v61 = vpop.permute.xlu0 %2159 }
 0x1ec   : > { %v2162_v62 = vunpack.i.h.bf16 %v2160_v61  ;;  %v2161_v63 = vunpack.i.l.bf16 %v2160_v61 }
 0x1ed   : > { %v884_v4 = vsel %vm877_vm14, %v819_v3, %v2166_v60  ;;  %v885_v59 = vsel %vm877_vm14, %v805_v36, %v2167_v58 }
 0x1ee   : > { %v882_v1 = vsel %vm877_vm14, %v817_v54, %v2161_v63  ;;  %v883_v5 = vsel %vm877_vm14, %v807_v31, %v2162_v62  ;;  %v892_v6 = vpack.c.bf16 %v885_v59, %v884_v4 }
 0x1ef   : > { %v890_v7 = vpack.c.bf16 %v883_v5, %v882_v1 }
 0x1f1   : > { %1050 = vmatmul.mubr.bf16.gmra.mrb[4].mxu1 %v888_v55 }
 0x1f2   : > { %2022 = vmatprep.mubr.msk.bf16.mxu1 %vm877_vm14, %v891_v34 }
 0x1f9   : > { %1058 = vmatmul.mubr.bf16.gmra.mrb[8].mxu1 %v890_v7 }
 0x1fa   : > { %2023 = vmatprep.mubr.msk.bf16.mxu1 %vm877_vm14, %v893_v38 }
 0x201   : > { %1066 = vmatmul.mubr.bf16.gmra.mrb[12].mxu1 %v892_v6 }
 0x2bc   : > { %v1043_v25 = vpop.f32.mrb[0].mxu1 }
 0x2bd   : > { %v1044_v26 = vadd.f32 %v2673_v23, %v1043_v25  ;;  %v1045_v27 = vpop.f32.mrb[1].mxu1 }
 0x2be   : > { %v1046_v28 = vpop.f32.mrb[2].mxu1 }
 0x2bf   : > { %v2680_v29 = vmax.f32 %v1044_v26, 0.0  ;;  %v1047_v30 = vadd.f32 %v2673_v23, %v1046_v28  ;;  %v1048_v31 = vpop.f32.mrb[3].mxu1 }
 0x2c1   : > { %v1075_v33 = vmax.f32 %v1047_v30, 0.0  ;;  %v1082_v34 = vrot.slane %v2680_v29, 7  ;;  %v1106_v35 = vrot.slane %v2680_v29, 1 }
 0x2c3   : > { %v1083_v36 = vrot.slane %v1075_v33, 7  ;;  %v1107_v37 = vrot.slane %v1075_v33, 1  ;;  %v2168_v38 = vpack.i.bf16 %v1075_v33, %v2680_v29 }
 0x2c4   : > { %v1051_v39 = vpop.f32.mrb[4].mxu1 }
 0x2c5   : > { %v1052_v40 = vadd.f32 %v2673_v23, %v1051_v39  ;;  %v1053_v41 = vpop.f32.mrb[5].mxu1  ;;  %2169 = vrot.lane.b32.xlu0 %v2168_v38, %s2289_s24  ;;  %v1120_v42 = vsel %vm569_vm1, %v1106_v35, %v1107_v37  ;;  %v2696_v45 = vsel %vm528_vm2, %v1082_v34, %v1083_v36 }
 0x2c6   : > { %v1054_v46 = vpop.f32.mrb[6].mxu1 }
 0x2c7   : > { %v1076_v44 = vmax.f32 %v1052_v40, 0.0  ;;  %v1055_v48 = vadd.f32 %v2673_v23, %v1054_v46  ;;  %v1056_v49 = vpop.f32.mrb[7].mxu1 }
 0x2c9   : > { %v1084_v50 = vrot.slane %v1076_v44, 7  ;;  %v1108_v52 = vrot.slane %v1076_v44, 1  ;;  %v1077_v53 = vmax.f32 %v1055_v48, 0.0 }
 0x2cb   : > { %v1085_v55 = vrot.slane %v1077_v53, 7  ;;  %v1109_v56 = vrot.slane %v1077_v53, 1  ;;  %v2173_v57 = vpack.i.bf16 %v1077_v53, %v1076_v44  ;;  %v1119_v58 = vsel %vm569_vm1, %v1107_v37, %v1108_v52 }
 0x2cc   : > { %v1059_v60 = vpop.f32.mrb[8].mxu1  ;;  %v1123_v61 = vsel %vm2384_vm3, %v1119_v58, 0.0  ;;  %v2705_v62 = vsel %vm528_vm2, %v1083_v36, %v1084_v50 }
 0x2cd   : > { %v1060_v63 = vadd.f32 %v2673_v23, %v1059_v60  ;;  %v1061_v3 = vpop.f32.mrb[9].mxu1  ;;  %2174 = vrot.lane.b32.xlu1 %v2173_v57, %s2289_s24  ;;  %v1171_v54 = vpack.c.bf16 %v1123_v61, %v1120_v42  ;;  %v1118_v4 = vsel %vm569_vm1, %v1108_v52, %v1109_v56  ;;  %v1094_v59 = vsel %vm528_vm2, %v1084_v50, %v1085_v55 }
 0x2ce   : > { %v1062_v1 = vpop.f32.mrb[10].mxu1 }
 0x2cf   : > { %v1078_v5 = vmax.f32 %v1060_v63, 0.0  ;;  %v1063_v6 = vadd.f32 %v2673_v23, %v1062_v1  ;;  %v1064_v7 = vpop.f32.mrb[11].mxu1  ;;  %2037 = vmatprep.mubr.msk.bf16.mxu0 %vm877_vm14, %v1171_v54  ;;  %v1100_v54 = vsel %vm2463_vm9, %v2705_v62, 0.0 }
 0x2d1   : > { %v1086_v0 = vrot.slane %v1078_v5, 7  ;;  %v1110_v9 = vrot.slane %v1078_v5, 1  ;;  %v1079_v11 = vmax.f32 %v1063_v6, 0.0 }
 0x2d3   : > { %v1087_v12 = vrot.slane %v1079_v11, 7  ;;  %v1111_v13 = vrot.slane %v1079_v11, 1  ;;  %v2178_v14 = vpack.i.bf16 %v1079_v11, %v1078_v5  ;;  %v1117_v15 = vsel %vm569_vm1, %v1109_v56, %v1110_v9 }
 0x2d4   : > { %v1067_v17 = vpop.f32.mrb[12].mxu1  ;;  %v1125_v18 = vsel %vm2393_vm4, %v1117_v15, 0.0  ;;  %v1093_v20 = vsel %vm528_vm2, %v1085_v55, %v1086_v0 }
 0x2d5   : > { %v1068_v21 = vadd.f32 %v2673_v23, %v1067_v17  ;;  %v1069_v24 = vpop.f32.mrb[13].mxu1  ;;  %2179 = vrot.lane.b32.xlu0 %v2178_v14, %s2289_s24  ;;  %v1173_v25 = vpack.c.bf16 %v1125_v18, %v1118_v4  ;;  %v1116_v26 = vsel %vm569_vm1, %v1110_v9, %v1111_v13  ;;  %v1092_v27 = vsel %vm528_vm2, %v1086_v0, %v1087_v12 }
 0x2d6   : > { %v1070_v28 = vpop.f32.mrb[14].mxu1  ;;  %v1102_v0 = vsel %vm2468_vm11, %v1093_v20, 0.0  ;;  %v2254_v20 = vld [vmem:[%s3092_s7] sm:$0xff]   ;;  %v2256_v24 = vld [vmem:[%s3092_s7 + $0x10] sm:$0xff]  }
 0x2d7   : > { %v1080_v30 = vmax.f32 %v1068_v21, 0.0  ;;  %v1071_v31 = vadd.f32 %v2673_v23, %v1070_v28  ;;  %v1072_v33 = vpop.f32.mrb[15].mxu1  ;;  %1578 = vmatpush1.bf16.msra.mxu1 %v2254_v20  ;;  %v2255_v21 = vld [vmem:[%s3092_s7 + $0x8] sm:$0xff]   ;;  %v2260_v28 = vld [vmem:[%s3092_s7 + $0x30] sm:$0xff]  }
 0x2d8   : > { %1579 = vmatprep.subr.bf16.mxu1 %v2288_v8  ;;  %v2263_v33 = vld [vmem:[%s3092_s7 + $0x48] sm:$0xff]  }
 0x2d9   : > { %v1088_v36 = vrot.slane %v1080_v30, 7  ;;  %v1112_v37 = vrot.slane %v1080_v30, 1  ;;  %v1081_v38 = vmax.f32 %v1071_v31, 0.0  ;;  %v2262_v31 = vld [vmem:[%s3092_s7 + $0x40] sm:$0xff]  }
 0x2db   : > { %v1089_v39 = vrot.slane %v1081_v38, 7  ;;  %v1113_v40 = vrot.slane %v1081_v38, 1  ;;  %v2183_v41 = vpack.i.bf16 %v1081_v38, %v1080_v30  ;;  %v1115_v42 = vsel %vm569_vm1, %v1111_v13, %v1112_v37  ;;  %1580 = vmatpush1.bf16.msra.mxu1 %v2255_v21  ;;  %v2261_v30 = vld [vmem:[%s3092_s7 + $0x38] sm:$0xff]  }
 0x2dc   : > { %v1127_v46 = vsel %vm2407_vm5, %v1115_v42, 0.0  ;;  %v1091_v44 = vsel %vm528_vm2, %v1087_v12, %v1088_v36  ;;  %1581 = vmatprep.subr.bf16.mxu1 %v2288_v8  ;;  %v2265_v38 = vld [vmem:[%s3092_s7 + $0x58] sm:$0xff]  }
 0x2dd   : > { %2184 = vrot.lane.b32.xlu1 %v2183_v41, %s2289_s24  ;;  %v1097_v23 = vsel %vm528_vm2, %v1089_v39, %v1082_v34  ;;  %v1175_v48 = vpack.c.bf16 %v1127_v46, %v1116_v26  ;;  %v1114_v49 = vsel %vm569_vm1, %v1112_v37, %v1113_v40  ;;  %v1121_v50 = vsel %vm569_vm1, %v1113_v40, %v1106_v35  ;;  %v2258_v26 = vld [vmem:[%s3092_s7 + $0x20] sm:$0xff]  }
 0x2de   : > { %v1129_v52 = vsel %vm2415_vm6, %v1121_v50, 0.0  ;;  %v1090_v53 = vsel %vm528_vm2, %v1088_v36, %v1089_v39  ;;  %v1098_v34 = vsel %vm2457_vm7, %v1097_v23, 0.0  ;;  %v1104_v14 = vsel %vm2483_vm13, %v1091_v44, 0.0  ;;  %v2264_v36 = vld [vmem:[%s3092_s7 + $0x50] sm:$0xff]   ;;  %v2817_v37 = vld [vmem:[%s3091_s6] ss:$0 sm:$0xff] }
 0x2df   : > { %v1177_v55 = vpack.c.bf16 %v1129_v52, %v1114_v49  ;;  %1582 = vmatpush1.bf16.msra.mxu1 %v2256_v24 }
 0x2e0   : > { %1583 = vmatprep.subr.bf16.mxu1 %v2288_v8 }
 0x337   : > { %v2170_v56 = vpop.permute.xlu0 %2169 }
 0x338   : > { %v2172_v57 = vunpack.i.h.bf16 %v2170_v56  ;;  %v2171_v58 = vunpack.i.l.bf16 %v2170_v56 }
 0x33a   : > { %v1162_v60 = vsel %vm877_vm14, %v1098_v34, %v2171_v58  ;;  %v1163_v29 = vsel %vm877_vm14, %v2696_v45, %v2172_v57 }
 0x33b   : > { %v1170_v61 = vpack.c.bf16 %v1163_v29, %v1162_v60 }
 0x33d   : > { %1326 = vmatmul.mubr.bf16.vlgmr.msra.gmra.mrb[8].mxu0 %v1170_v61 }
 0x33e   : > { %2038 = vmatprep.mubr.msk.bf16.mxu0 %vm877_vm14, %v1173_v25  ;;  %v2257_v25 = vld [vmem:[%s3092_s7 + $0x18] sm:$0xff]  }
 0x33f   : > { %v2175_v35 = vpop.permute.xlu1 %2174  ;;  %1584 = vmatpush1.bf16.msra.mxu1 %v2257_v25 }
 0x340   : > { %v2177_v63 = vunpack.i.h.bf16 %v2175_v35  ;;  %v2176_v3 = vunpack.i.l.bf16 %v2175_v35  ;;  %1585 = vmatprep.subr.bf16.mxu1 %v2288_v8 }
 0x342   : > { %v1164_v4 = vsel %vm877_vm14, %v1100_v54, %v2176_v3  ;;  %v1165_v1 = vsel %vm877_vm14, %v1094_v59, %v2177_v63 }
 0x343   : > { %v1172_v5 = vpack.c.bf16 %v1165_v1, %v1164_v4  ;;  %1586 = vmatpush1.bf16.msra.mxu1 %v2258_v26 }
 0x344   : > { %1587 = vmatprep.subr.bf16.mxu1 %v2288_v8 }
 0x345   : > { %1334 = vmatmul.mubr.bf16.gmra.mrb[12].mxu0 %v1172_v5 }
 0x346   : > { %2039 = vmatprep.mubr.msk.bf16.mxu0 %vm877_vm14, %v1175_v48 }
 0x347   : > { %v2180_v45 = vpop.permute.xlu0 %2179 }
 0x348   : > { %v2182_v6 = vunpack.i.h.bf16 %v2180_v45  ;;  %v2181_v7 = vunpack.i.l.bf16 %v2180_v45 }
 0x34a   : > { %v1166_v9 = vsel %vm877_vm14, %v1102_v0, %v2181_v7  ;;  %v1167_v11 = vsel %vm877_vm14, %v1092_v27, %v2182_v6  ;;  %v2259_v27 = vld [vmem:[%s3092_s7 + $0x28] sm:$0xff]  }
 0x34b   : > { %v1174_v12 = vpack.c.bf16 %v1167_v11, %v1166_v9  ;;  %1588 = vmatpush1.bf16.msra.mxu1 %v2259_v27 }
 0x34c   : > { %1589 = vmatprep.subr.bf16.mxu1 %v2288_v8 }
 0x34d   : > { %1342 = vmatmul.mubr.bf16.gmra.mrb[16].mxu0 %v1174_v12 }
 0x34e   : > { %2040 = vmatprep.mubr.msk.bf16.mxu0 %vm877_vm14, %v1177_v55 }
 0x34f   : > { %v2185_v62 = vpop.permute.xlu1 %2184  ;;  %1590 = vmatpush1.bf16.msra.mxu1 %v2260_v28 }
 0x350   : > { %v2187_v59 = vunpack.i.h.bf16 %v2185_v62  ;;  %v2186_v13 = vunpack.i.l.bf16 %v2185_v62  ;;  %1591 = vmatprep.subr.bf16.mxu1 %v2288_v8 }
 0x352   : > { %v1168_v15 = vsel %vm877_vm14, %v1104_v14, %v2186_v13  ;;  %v1169_v17 = vsel %vm877_vm14, %v1090_v53, %v2187_v59 }
 0x353   : > { %v1176_v18 = vpack.c.bf16 %v1169_v17, %v1168_v15  ;;  %1592 = vmatpush1.bf16.msra.mxu1 %v2261_v30 }
 0x354   : > { %1593 = vmatprep.subr.bf16.mxu1 %v2288_v8 }
 0x355   : > { %1350 = vmatmul.mubr.bf16.gmra.mrb[20].mxu0 %v1176_v18 }
 0x357   : > { %1594 = vmatpush1.bf16.msra.mxu1 %v2262_v31 }
 0x358   : > { %1595 = vmatprep.subr.bf16.mxu1 %v2288_v8 }
 0x35b   : > { %1596 = vmatpush1.bf16.msra.mxu1 %v2263_v33 }
 0x35c   : > { %1597 = vmatprep.subr.bf16.mxu1 %v2288_v8 }
 0x35f   : > { %1598 = vmatpush1.bf16.msra.mxu1 %v2264_v36 }
 0x360   : > { %1599 = vmatprep.subr.bf16.mxu1 %v2288_v8 }
 0x363   : > { %1600 = vmatpush1.bf16.msra.mxu1 %v2265_v38 }
 0x410   : > { %v1327_v39 = vpop.f32.mrb[8].mxu0 }
 0x411   : > { %v1328_v40 = vadd.f32 %v2817_v37, %v1327_v39  ;;  %v1329_v41 = vpop.f32.mrb[9].mxu0 }
 0x412   : > { %v1330_v42 = vpop.f32.mrb[10].mxu0 }
 0x413   : > { %v2823_v46 = vmax.f32 %v1328_v40, 0.0  ;;  %v1331_v44 = vadd.f32 %v2817_v37, %v1330_v42  ;;  %v1332_v23 = vpop.f32.mrb[11].mxu0 }
 0x415   : > { %v1359_v48 = vmax.f32 %v1331_v44, 0.0  ;;  %v1366_v49 = vrot.slane %v2823_v46, 7  ;;  %v1390_v50 = vrot.slane %v2823_v46, 1 }
 0x417   : > { %v1367_v52 = vrot.slane %v1359_v48, 7  ;;  %v1391_v53 = vrot.slane %v1359_v48, 1  ;;  %v2188_v55 = vpack.i.bf16 %v1359_v48, %v2823_v46 }
 0x418   : > { %v1335_v56 = vpop.f32.mrb[12].mxu0 }
 0x419   : > { %v1336_v57 = vadd.f32 %v2817_v37, %v1335_v56  ;;  %v1337_v58 = vpop.f32.mrb[13].mxu0  ;;  %2189 = vrot.lane.b32.xlu0 %v2188_v55, %s2289_s24  ;;  %v1404_v34 = vsel %vm569_vm1, %v1390_v50, %v1391_v53  ;;  %v2839_v60 = vsel %vm528_vm2, %v1366_v49, %v1367_v52 }
 0x41a   : > { %v1338_v29 = vpop.f32.mrb[14].mxu0 }
 0x41b   : > { %v1360_v61 = vmax.f32 %v1336_v57, 0.0  ;;  %v1339_v35 = vadd.f32 %v2817_v37, %v1338_v29  ;;  %v1340_v63 = vpop.f32.mrb[15].mxu0 }
 0x41d   : > { %v1368_v3 = vrot.slane %v1360_v61, 7  ;;  %v1392_v54 = vrot.slane %v1360_v61, 1  ;;  %v1361_v4 = vmax.f32 %v1339_v35, 0.0 }
 0x41f   : > { %v1369_v1 = vrot.slane %v1361_v4, 7  ;;  %v1393_v5 = vrot.slane %v1361_v4, 1  ;;  %v2193_v45 = vpack.i.bf16 %v1361_v4, %v1360_v61  ;;  %v1403_v6 = vsel %vm569_vm1, %v1391_v53, %v1392_v54 }
 0x420   : > { %v1343_v7 = vpop.f32.mrb[16].mxu0  ;;  %v1407_v0 = vsel %vm2384_vm3, %v1403_v6, 0.0  ;;  %v2848_v9 = vsel %vm528_vm2, %v1367_v52, %v1368_v3 }
 0x421   : > { %v1344_v11 = vadd.f32 %v2817_v37, %v1343_v7  ;;  %v1345_v12 = vpop.f32.mrb[17].mxu0  ;;  %2194 = vrot.lane.b32.xlu1 %v2193_v45, %s2289_s24  ;;  %v1455_v62 = vpack.c.bf16 %v1407_v0, %v1404_v34  ;;  %v1402_v59 = vsel %vm569_vm1, %v1392_v54, %v1393_v5  ;;  %v1378_v13 = vsel %vm528_vm2, %v1368_v3, %v1369_v1 }
 0x422   : > { %v1346_v14 = vpop.f32.mrb[18].mxu0 }
 0x423   : > { %v1362_v15 = vmax.f32 %v1344_v11, 0.0  ;;  %v1347_v17 = vadd.f32 %v2817_v37, %v1346_v14  ;;  %v1348_v18 = vpop.f32.mrb[19].mxu0  ;;  %2054 = vmatprep.mubr.msk.bf16.mxu1 %vm877_vm14, %v1455_v62  ;;  %v1384_v62 = vsel %vm2463_vm9, %v2848_v9, 0.0 }
 0x425   : > { %v1370_v20 = vrot.slane %v1362_v15, 7  ;;  %v1394_v21 = vrot.slane %v1362_v15, 1  ;;  %v1363_v24 = vmax.f32 %v1347_v17, 0.0 }
 0x427   : > { %v1371_v25 = vrot.slane %v1363_v24, 7  ;;  %v1395_v26 = vrot.slane %v1363_v24, 1  ;;  %v2198_v27 = vpack.i.bf16 %v1363_v24, %v1362_v15  ;;  %v1401_v28 = vsel %vm569_vm1, %v1393_v5, %v1394_v21 }
 0x428   : > { %v1351_v30 = vpop.f32.mrb[20].mxu0  ;;  %v1409_v31 = vsel %vm2393_vm4, %v1401_v28, 0.0  ;;  %v1377_v33 = vsel %vm528_vm2, %v1369_v1, %v1370_v20 }
 0x429   : > { %v1352_v36 = vadd.f32 %v2817_v37, %v1351_v30  ;;  %v1353_v38 = vpop.f32.mrb[21].mxu0  ;;  %2199 = vrot.lane.b32.xlu0 %v2198_v27, %s2289_s24  ;;  %v1457_v39 = vpack.c.bf16 %v1409_v31, %v1402_v59  ;;  %v1400_v40 = vsel %vm569_vm1, %v1394_v21, %v1395_v26  ;;  %v1376_v41 = vsel %vm528_vm2, %v1370_v20, %v1371_v25 }
 0x42a   : > { %v1354_v42 = vpop.f32.mrb[22].mxu0  ;;  %v1386_v20 = vsel %vm2468_vm11, %v1377_v33, 0.0  ;;  %v2266_v33 = vld [vmem:[%s3094_s9] sm:$0xff]   ;;  %v2268_v38 = vld [vmem:[%s3094_s9 + $0x10] sm:$0xff]  }
 0x42b   : > { %v1364_v44 = vmax.f32 %v1352_v36, 0.0  ;;  %v1355_v23 = vadd.f32 %v2817_v37, %v1354_v42  ;;  %v1356_v48 = vpop.f32.mrb[23].mxu0  ;;  %1862 = vmatpush1.bf16.msra.mxu0 %v2266_v33  ;;  %v2267_v36 = vld [vmem:[%s3094_s9 + $0x8] sm:$0xff]   ;;  %v2272_v42 = vld [vmem:[%s3094_s9 + $0x30] sm:$0xff]  }
 0x42c   : > { %1863 = vmatprep.subr.bf16.mxu0 %v2288_v8  ;;  %v2275_v48 = vld [vmem:[%s3094_s9 + $0x48] sm:$0xff]  }
 0x42d   : > { %v1372_v52 = vrot.slane %v1364_v44, 7  ;;  %v1396_v53 = vrot.slane %v1364_v44, 1  ;;  %v1365_v55 = vmax.f32 %v1355_v23, 0.0  ;;  %v2274_v23 = vld [vmem:[%s3094_s9 + $0x40] sm:$0xff]  }
 0x42f   : > { %v1373_v56 = vrot.slane %v1365_v55, 7  ;;  %v1397_v57 = vrot.slane %v1365_v55, 1  ;;  %v2203_v58 = vpack.i.bf16 %v1365_v55, %v1364_v44  ;;  %v1399_v34 = vsel %vm569_vm1, %v1395_v26, %v1396_v53  ;;  %1864 = vmatpush1.bf16.msra.mxu0 %v2267_v36  ;;  %v2273_v44 = vld [vmem:[%s3094_s9 + $0x38] sm:$0xff]  }
 0x430   : > { %v1411_v29 = vsel %vm2407_vm5, %v1399_v34, 0.0  ;;  %v1375_v61 = vsel %vm528_vm2, %v1371_v25, %v1372_v52  ;;  %1865 = vmatprep.subr.bf16.mxu0 %v2288_v8  ;;  %v2277_v55 = vld [vmem:[%s3094_s9 + $0x58] sm:$0xff]  }
 0x431   : > { %2204 = vrot.lane.b32.xlu1 %v2203_v58, %s2289_s24  ;;  %v1381_v37 = vsel %vm528_vm2, %v1373_v56, %v1366_v49  ;;  %v1459_v35 = vpack.c.bf16 %v1411_v29, %v1400_v40  ;;  %v1398_v63 = vsel %vm569_vm1, %v1396_v53, %v1397_v57  ;;  %v1405_v3 = vsel %vm569_vm1, %v1397_v57, %v1390_v50  ;;  %v2270_v40 = vld [vmem:[%s3094_s9 + $0x20] sm:$0xff]  }
 0x432   : > { %v1413_v54 = vsel %vm2415_vm6, %v1405_v3, 0.0  ;;  %v1374_v4 = vsel %vm528_vm2, %v1372_v52, %v1373_v56  ;;  %v1382_v49 = vsel %vm2457_vm7, %v1381_v37, 0.0  ;;  %v1388_v27 = vsel %vm2483_vm13, %v1375_v61, 0.0  ;;  %v2276_v52 = vld [vmem:[%s3094_s9 + $0x50] sm:$0xff]   ;;  %v2960_v53 = vld [vmem:[%s3093_s8] ss:$0 sm:$0xff] }
 0x433   : > { %v1461_v1 = vpack.c.bf16 %v1413_v54, %v1398_v63  ;;  %1866 = vmatpush1.bf16.msra.mxu0 %v2268_v38 }
 0x434   : > { %1867 = vmatprep.subr.bf16.mxu0 %v2288_v8 }
 0x48b   : > { %v2190_v5 = vpop.permute.xlu0 %2189 }
 0x48c   : > { %v2192_v45 = vunpack.i.h.bf16 %v2190_v5  ;;  %v2191_v6 = vunpack.i.l.bf16 %v2190_v5 }
 0x48e   : > { %v1446_v7 = vsel %vm877_vm14, %v1382_v49, %v2191_v6  ;;  %v1447_v46 = vsel %vm877_vm14, %v2839_v60, %v2192_v45 }
 0x48f   : > { %v1454_v0 = vpack.c.bf16 %v1447_v46, %v1446_v7 }
 0x491   : > { %1610 = vmatmul.mubr.bf16.vlgmr.msra.gmra.mrb[16].mxu1 %v1454_v0 }
 0x492   : > { %2055 = vmatprep.mubr.msk.bf16.mxu1 %vm877_vm14, %v1457_v39  ;;  %v2269_v39 = vld [vmem:[%s3094_s9 + $0x18] sm:$0xff]  }
 0x493   : > { %v2195_v50 = vpop.permute.xlu1 %2194  ;;  %1868 = vmatpush1.bf16.msra.mxu0 %v2269_v39 }
 0x494   : > { %v2197_v11 = vunpack.i.h.bf16 %v2195_v50  ;;  %v2196_v12 = vunpack.i.l.bf16 %v2195_v50  ;;  %1869 = vmatprep.subr.bf16.mxu0 %v2288_v8 }
 0x496   : > { %v1448_v59 = vsel %vm877_vm14, %v1384_v62, %v2196_v12  ;;  %v1449_v14 = vsel %vm877_vm14, %v1378_v13, %v2197_v11 }
 0x497   : > { %v1456_v15 = vpack.c.bf16 %v1449_v14, %v1448_v59  ;;  %1870 = vmatpush1.bf16.msra.mxu0 %v2270_v40 }
 0x498   : > { %1871 = vmatprep.subr.bf16.mxu0 %v2288_v8 }
 0x499   : > { %1618 = vmatmul.mubr.bf16.gmra.mrb[20].mxu1 %v1456_v15 }
 0x49a   : > { %2056 = vmatprep.mubr.msk.bf16.mxu1 %vm877_vm14, %v1459_v35 }
 0x49b   : > { %v2200_v60 = vpop.permute.xlu0 %2199 }
 0x49c   : > { %v2202_v17 = vunpack.i.h.bf16 %v2200_v60  ;;  %v2201_v18 = vunpack.i.l.bf16 %v2200_v60 }
 0x49e   : > { %v1450_v21 = vsel %vm877_vm14, %v1386_v20, %v2201_v18  ;;  %v1451_v24 = vsel %vm877_vm14, %v1376_v41, %v2202_v17  ;;  %v2271_v41 = vld [vmem:[%s3094_s9 + $0x28] sm:$0xff]  }
 0x49f   : > { %v1458_v25 = vpack.c.bf16 %v1451_v24, %v1450_v21  ;;  %1872 = vmatpush1.bf16.msra.mxu0 %v2271_v41 }
 0x4a0   : > { %1873 = vmatprep.subr.bf16.mxu0 %v2288_v8 }
 0x4a1   : > { %1626 = vmatmul.mubr.bf16.gmra.mrb[24].mxu1 %v1458_v25 }
 0x4a2   : > { %2057 = vmatprep.mubr.msk.bf16.mxu1 %vm877_vm14, %v1461_v1 }
 0x4a3   : > { %v2205_v9 = vpop.permute.xlu1 %2204  ;;  %1874 = vmatpush1.bf16.msra.mxu0 %v2272_v42 }
 0x4a4   : > { %v2207_v13 = vunpack.i.h.bf16 %v2205_v9  ;;  %v2206_v26 = vunpack.i.l.bf16 %v2205_v9  ;;  %1875 = vmatprep.subr.bf16.mxu0 %v2288_v8 }
 0x4a6   : > { %v1452_v28 = vsel %vm877_vm14, %v1388_v27, %v2206_v26  ;;  %v1453_v30 = vsel %vm877_vm14, %v1374_v4, %v2207_v13 }
 0x4a7   : > { %v1460_v31 = vpack.c.bf16 %v1453_v30, %v1452_v28  ;;  %1876 = vmatpush1.bf16.msra.mxu0 %v2273_v44 }
 0x4a8   : > { %1877 = vmatprep.subr.bf16.mxu0 %v2288_v8 }
 0x4a9   : > { %1634 = vmatmul.mubr.bf16.gmra.mrb[28].mxu1 %v1460_v31 }
 0x4ab   : > { %1878 = vmatpush1.bf16.msra.mxu0 %v2274_v23 }
 0x4ac   : > { %1879 = vmatprep.subr.bf16.mxu0 %v2288_v8 }
 0x4af   : > { %1880 = vmatpush1.bf16.msra.mxu0 %v2275_v48 }
 0x4b0   : > { %1881 = vmatprep.subr.bf16.mxu0 %v2288_v8 }
 0x4b3   : > { %1882 = vmatpush1.bf16.msra.mxu0 %v2276_v52 }
 0x4b4   : > { %1883 = vmatprep.subr.bf16.mxu0 %v2288_v8 }
 0x4b7   : > { %1884 = vmatpush1.bf16.msra.mxu0 %v2277_v55 }
 0x564   : > { %v1611_v56 = vpop.f32.mrb[16].mxu1 }
 0x565   : > { %v1612_v57 = vadd.f32 %v2960_v53, %v1611_v56  ;;  %v1613_v58 = vpop.f32.mrb[17].mxu1 }
 0x566   : > { %v1614_v34 = vpop.f32.mrb[18].mxu1 }
 0x567   : > { %v2966_v29 = vmax.f32 %v1612_v57, 0.0  ;;  %v1615_v61 = vadd.f32 %v2960_v53, %v1614_v34  ;;  %v1616_v8 = vpop.f32.mrb[19].mxu1 }
 0x569   : > { %v1643_v37 = vmax.f32 %v1615_v61, 0.0  ;;  %v1650_v35 = vrot.slane %v2966_v29, 7  ;;  %v1674_v63 = vrot.slane %v2966_v29, 1 }
 0x56b   : > { %v1651_v3 = vrot.slane %v1643_v37, 7  ;;  %v1675_v54 = vrot.slane %v1643_v37, 1  ;;  %v2208_v4 = vpack.i.bf16 %v1643_v37, %v2966_v29 }
 0x56c   : > { %v1619_v1 = vpop.f32.mrb[20].mxu1 }
 0x56d   : > { %v1620_v5 = vadd.f32 %v2960_v53, %v1619_v1  ;;  %v1621_v45 = vpop.f32.mrb[21].mxu1  ;;  %2209 = vrot.lane.b32.xlu0 %v2208_v4, %s2289_s24  ;;  %v1688_v6 = vsel %vm569_vm1, %v1674_v63, %v1675_v54  ;;  %v2982_v49 = vsel %vm528_vm2, %v1650_v35, %v1651_v3 }
 0x56e   : > { %v1622_v7 = vpop.f32.mrb[22].mxu1 }
 0x56f   : > { %v1644_v46 = vmax.f32 %v1620_v5, 0.0  ;;  %v1623_v0 = vadd.f32 %v2960_v53, %v1622_v7  ;;  %v1624_v50 = vpop.f32.mrb[23].mxu1 }
 0x571   : > { %v1652_v11 = vrot.slane %v1644_v46, 7  ;;  %v1676_v12 = vrot.slane %v1644_v46, 1  ;;  %v1645_v62 = vmax.f32 %v1623_v0, 0.0 }
 0x573   : > { %v1653_v59 = vrot.slane %v1645_v62, 7  ;;  %v1677_v14 = vrot.slane %v1645_v62, 1  ;;  %v2213_v15 = vpack.i.bf16 %v1645_v62, %v1644_v46  ;;  %v1687_v60 = vsel %vm569_vm1, %v1675_v54, %v1676_v12 }
 0x574   : > { %v1627_v17 = vpop.f32.mrb[24].mxu1  ;;  %v1691_v18 = vsel %vm2384_vm3, %v1687_v60, 0.0  ;;  %v2991_v20 = vsel %vm528_vm2, %v1651_v3, %v1652_v11 }
 0x575   : > { %v1628_v21 = vadd.f32 %v2960_v53, %v1627_v17  ;;  %v1629_v24 = vpop.f32.mrb[25].mxu1  ;;  %2214 = vrot.lane.b32.xlu1 %v2213_v15, %s2289_s24  ;;  %v1739_v25 = vpack.c.bf16 %v1691_v18, %v1688_v6  ;;  %v1686_v9 = vsel %vm569_vm1, %v1676_v12, %v1677_v14  ;;  %v1662_v13 = vsel %vm528_vm2, %v1652_v11, %v1653_v59 }
 0x576   : > { %v1630_v26 = vpop.f32.mrb[26].mxu1  ;;  %v1668_v15 = vsel %vm2463_vm9, %v2991_v20, 0.0 }
 0x577   : > { %v1646_v27 = vmax.f32 %v1628_v21, 0.0  ;;  %v1631_v22 = vadd.f32 %v2960_v53, %v1630_v26  ;;  %v1632_v28 = vpop.f32.mrb[27].mxu1  ;;  %2071 = vmatprep.mubr.msk.bf16.mxu0 %vm877_vm14, %v1739_v25 }
 0x579   : > { %v1654_v30 = vrot.slane %v1646_v27, 7  ;;  %v1678_v31 = vrot.slane %v1646_v27, 1  ;;  %v1647_v33 = vmax.f32 %v1631_v22, 0.0 }
 0x57b   : > { %v1655_v36 = vrot.slane %v1647_v33, 7  ;;  %v1679_v38 = vrot.slane %v1647_v33, 1  ;;  %v2218_v39 = vpack.i.bf16 %v1647_v33, %v1646_v27  ;;  %v1685_v40 = vsel %vm569_vm1, %v1677_v14, %v1678_v31 }
 0x57c   : > { %v1635_v41 = vpop.f32.mrb[28].mxu1  ;;  %v1693_v42 = vsel %vm2393_vm4, %v1685_v40, 0.0  ;;  %v1661_v44 = vsel %vm528_vm2, %v1653_v59, %v1654_v30 }
 0x57d   : > { %v1636_v23 = vadd.f32 %v2960_v53, %v1635_v41  ;;  %v1637_v48 = vpop.f32.mrb[29].mxu1  ;;  %2219 = vrot.lane.b32.xlu0 %v2218_v39, %s2289_s24  ;;  %v1741_v52 = vpack.c.bf16 %v1693_v42, %v1686_v9  ;;  %v1684_v55 = vsel %vm569_vm1, %v1678_v31, %v1679_v38  ;;  %v1660_v56 = vsel %vm528_vm2, %v1654_v30, %v1655_v36  ;;  %v2058_v30 = vld [vmem:[%s3095_s10] ss:$0 sm:$0xff] }
 0x57e   : > { %v1638_v57 = vpop.f32.mrb[30].mxu1  ;;  %v1670_v24 = vsel %vm2468_vm11, %v1661_v44, 0.0 }
 0x57f   : > { %v1648_v58 = vmax.f32 %v1636_v23, 0.0  ;;  %v1639_v32 = vadd.f32 %v2960_v53, %v1638_v57  ;;  %v1640_v34 = vpop.f32.mrb[31].mxu1 }
 0x581   : > { %v1656_v61 = vrot.slane %v1648_v58, 7  ;;  %v1680_v8 = vrot.slane %v1648_v58, 1  ;;  %v1649_v37 = vmax.f32 %v1639_v32, 0.0 }
 0x583   : > { %v1657_v3 = vrot.slane %v1649_v37, 7  ;;  %v1681_v54 = vrot.slane %v1649_v37, 1  ;;  %v2223_v4 = vpack.i.bf16 %v1649_v37, %v1648_v58  ;;  %v1683_v1 = vsel %vm569_vm1, %v1679_v38, %v1680_v8 }
 0x584   : > { %v1695_v5 = vsel %vm2407_vm5, %v1683_v1, 0.0  ;;  %v1659_v45 = vsel %vm528_vm2, %v1655_v36, %v1656_v61 }
 0x585   : > { %2224 = vrot.lane.b32.xlu1 %v2223_v4, %s2289_s24  ;;  %v1665_v53 = vsel %vm528_vm2, %v1657_v3, %v1650_v35  ;;  %v1743_v6 = vpack.c.bf16 %v1695_v5, %v1684_v55  ;;  %v1682_v7 = vsel %vm569_vm1, %v1680_v8, %v1681_v54  ;;  %v1689_v47 = vsel %vm569_vm1, %v1681_v54, %v1674_v63 }
 0x586   : > { %v1697_v46 = vsel %vm2415_vm6, %v1689_v47, 0.0  ;;  %v1658_v0 = vsel %vm528_vm2, %v1656_v61, %v1657_v3  ;;  %v1666_v35 = vsel %vm2457_vm7, %v1665_v53, 0.0  ;;  %v1672_v27 = vsel %vm2483_vm13, %v1659_v45, 0.0 }
 0x587   : > { %v1745_v50 = vpack.c.bf16 %v1697_v46, %v1682_v7 }
 0x5df   : > { %v2210_v11 = vpop.permute.xlu0 %2209 }
 0x5e0   : > { %v2212_v12 = vunpack.i.h.bf16 %v2210_v11  ;;  %v2211_v62 = vunpack.i.l.bf16 %v2210_v11 }
 0x5e2   : > { %v1730_v59 = vsel %vm877_vm14, %v1666_v35, %v2211_v62  ;;  %v1731_v29 = vsel %vm877_vm14, %v2982_v49, %v2212_v12 }
 0x5e3   : > { %v1738_v14 = vpack.c.bf16 %v1731_v29, %v1730_v59 }
 0x5e5   : > { %1894 = vmatmul.mubr.bf16.vlgmr.msra.gmra.mrb[24].mxu0 %v1738_v14 }
 0x5e6   : > { %2072 = vmatprep.mubr.msk.bf16.mxu0 %vm877_vm14, %v1741_v52 }
 0x5e7   : > { %v2215_v51 = vpop.permute.xlu1 %2214 }
 0x5e8   : > { %v2217_v63 = vunpack.i.h.bf16 %v2215_v51  ;;  %v2216_v2 = vunpack.i.l.bf16 %v2215_v51 }
 0x5ea   : > { %v1732_v60 = vsel %vm877_vm14, %v1668_v15, %v2216_v2  ;;  %v1733_v10 = vsel %vm877_vm14, %v1662_v13, %v2217_v63 }
 0x5eb   : > { %v1740_v17 = vpack.c.bf16 %v1733_v10, %v1732_v60 }
 0x5ed   : > { %1902 = vmatmul.mubr.bf16.gmra.mrb[28].mxu0 %v1740_v17 }
 0x5ee   : > { %2073 = vmatprep.mubr.msk.bf16.mxu0 %vm877_vm14, %v1743_v6 }
 0x5ef   : > { %v2220_v49 = vpop.permute.xlu0 %2219 }
 0x5f0   : > { %v2222_v18 = vunpack.i.h.bf16 %v2220_v49  ;;  %v2221_v21 = vunpack.i.l.bf16 %v2220_v49 }
 0x5f2   : > { %v1734_v25 = vsel %vm877_vm14, %v1670_v24, %v2221_v21  ;;  %v1735_v16 = vsel %vm877_vm14, %v1660_v56, %v2222_v18 }
 0x5f3   : > { %v1742_v20 = vpack.c.bf16 %v1735_v16, %v1734_v25 }
 0x5f5   : > { %1910 = vmatmul.mubr.bf16.gmra.mrb[32].mxu0 %v1742_v20 }
 0x5f6   : > { %2074 = vmatprep.mubr.msk.bf16.mxu0 %vm877_vm14, %v1745_v50 }
 0x5f7   : > { %v2225_v9 = vpop.permute.xlu1 %2224 }
 0x5f8   : > { %v2227_v13 = vunpack.i.h.bf16 %v2225_v9  ;;  %v2226_v26 = vunpack.i.l.bf16 %v2225_v9 }
 0x5fa   : > { %v1736_v22 = vsel %vm877_vm14, %v1672_v27, %v2226_v26  ;;  %v1737_v19 = vsel %vm877_vm14, %v1658_v0, %v2227_v13 }
 0x5fb   : > { %v1744_v28 = vpack.c.bf16 %v1737_v19, %v1736_v22 }
 0x5fd   : > { %1918 = vmatmul.mubr.bf16.gmra.mrb[36].mxu0 %v1744_v28 }
 0x6b8   : > { %v1895_v43 = vpop.f32.mrb[24].mxu0 }
 0x6b9   : > { %v1896_v31 = vadd.f32 %v2058_v30, %v1895_v43  ;;  %v1897_v33 = vpop.f32.mrb[25].mxu0 }
 0x6ba   : > { %v1898_v36 = vpop.f32.mrb[26].mxu0 }
 0x6bb   : > { %1927 = vst.msk [vmem:[%s3064_s12] sm:$0xff] %vm1926_vm15, %v1896_v31  ;;  %v1899_v38 = vadd.f32 %v2058_v30, %v1898_v36  ;;  %v1900_v39 = vpop.f32.mrb[27].mxu0 }
 0x6bd   : > { %1928 = vst.msk [vmem:[%s3064_s12 + $0x8] sm:$0xff] %vm1926_vm15, %v1899_v38 }
 0x6c0   : > { %v1903_v40 = vpop.f32.mrb[28].mxu0 }
 0x6c1   : > { %v1904_v41 = vadd.f32 %v2058_v30, %v1903_v40  ;;  %v1905_v42 = vpop.f32.mrb[29].mxu0 }
 0x6c2   : > { %v1906_v44 = vpop.f32.mrb[30].mxu0 }
 0x6c3   : > { %1929 = vst.msk [vmem:[%s3064_s12 + $0x10] sm:$0xff] %vm1926_vm15, %v1904_v41  ;;  %v1907_v23 = vadd.f32 %v2058_v30, %v1906_v44  ;;  %v1908_v48 = vpop.f32.mrb[31].mxu0 }
 0x6c5   : > { %1930 = vst.msk [vmem:[%s3064_s12 + $0x18] sm:$0xff] %vm1926_vm15, %v1907_v23 }
 0x6c8   : > { %v1911_v52 = vpop.f32.mrb[32].mxu0 }
 0x6c9   : > { %v1912_v55 = vadd.f32 %v2058_v30, %v1911_v52  ;;  %v1913_v56 = vpop.f32.mrb[33].mxu0 }
 0x6ca   : > { %v1914_v57 = vpop.f32.mrb[34].mxu0 }
 0x6cb   : > { %1931 = vst.msk [vmem:[%s3064_s12 + $0x20] sm:$0xff] %vm1926_vm15, %v1912_v55  ;;  %v1915_v58 = vadd.f32 %v2058_v30, %v1914_v57  ;;  %v1916_v32 = vpop.f32.mrb[35].mxu0 }
 0x6cd   : > { %1932 = vst.msk [vmem:[%s3064_s12 + $0x28] sm:$0xff] %vm1926_vm15, %v1915_v58 }
 0x6d0   : > { %v1919_v34 = vpop.f32.mrb[36].mxu0 }
 0x6d1   : > { %v1920_v61 = vadd.f32 %v2058_v30, %v1919_v34  ;;  %v1921_v8 = vpop.f32.mrb[37].mxu0 }
 0x6d2   : > { %v1922_v37 = vpop.f32.mrb[38].mxu0 }
 0x6d3   : > { %1933 = vst.msk [vmem:[%s3064_s12 + $0x30] sm:$0xff] %vm1926_vm15, %v1920_v61  ;;  %v1923_v3 = vadd.f32 %v2058_v30, %v1922_v37  ;;  %v1924_v54 = vpop.f32.mrb[39].mxu0 }
 0x6d5   : > { %1934 = vst.msk [vmem:[%s3064_s12 + $0x38] sm:$0xff] %vm1926_vm15, %v1923_v3 }
 0x6d6 PF: > { %s21_s17 = sadd.s32 1, %s2284_s17  }
 0x6d7   : > { %p18_p4 = scmp.ge.s32.totalorder %s21_s17, 4  }
 0x6d9   :  { %20 = sbr.rel (!%p18_p4) target bundleno = 1 (0x1), region = 94 }

</bundles_post_ra>
